<compile_context>
chip_gen: v6e
topology: v6e:2x2x1
jax: 0.10.0
libtpu: 0.0.40
codegen_flags: <defaults>
</compile_context>

<pallas_src>
import functools

import jax
import jax.numpy as jnp
from jax.experimental import pallas as pl
from jax.experimental.pallas import tpu as pltpu


def _lstm_kernel(x_ref, wih0_ref, wihr_ref, whh_ref, b_ref, wfc_ref, bfc_ref,
                 out_ref, *, num_layers, hidden_size, seq_len):
    """Multi-layer LSTM + final Linear for one (batch=1) sequence.

    x_ref    : (T, I)       bf16  input sequence
    wih0_ref : (I, 4H)      bf16  layer-0 input->gates weight (transposed)
    wihr_ref : (max(L-1,1), H, 4H) bf16  layer>0 input->gates weights
    whh_ref  : (L, H, 4H)   bf16  hidden->gates weights (transposed)
    b_ref    : (L, 1, 4H)   f32   b_ih + b_hh
    wfc_ref  : (H, OP)      bf16  fc weight, zero-padded to OP lanes
    bfc_ref  : (1, OP)      f32   fc bias, zero-padded
    out_ref  : (T, OP)      f32   lane-dense output tile
    """
    T, H, L = seq_len, hidden_size, num_layers

    # Row-id column used to scatter each step's h into the value-carried
    # hidden sequence (pure VPU: iota + compare + select). Hoisted once.
    row_ids = jax.lax.broadcasted_iota(jnp.int32, (T, 1), 0)

    hs = None  # (T, H) f32 hidden sequence of the current layer (register value)
    for layer in range(L):
        # Hoisted input projection (bias folded): one MXU pass per layer.
        if layer == 0:
            gx = jnp.dot(x_ref[...], wih0_ref[...],
                         preferred_element_type=jnp.float32) + b_ref[0]
        else:
            gx = jnp.dot(hs.astype(jnp.bfloat16), wihr_ref[layer - 1],
                         preferred_element_type=jnp.float32) + b_ref[layer]

        whh = whh_ref[layer]                       # (H, 4H) bf16

        # Recurrent state lives in registers; the timestep loop is fully
        # unrolled (small static trip count) for scheduler visibility.
        h = jnp.zeros((1, H), jnp.float32)
        c = jnp.zeros((1, H), jnp.float32)
        hs = jnp.zeros((T, H), jnp.float32)
        for t in range(T):
            gates = gx[t:t + 1, :] + jnp.dot(
                h.astype(jnp.bfloat16), whh, preferred_element_type=jnp.float32)
            sig = jax.nn.sigmoid(gates)            # full-width: i, f, o gates
            # PyTorch gate ordering: i, f, g, o
            i_g = sig[:, 0 * H:1 * H]
            f_g = sig[:, 1 * H:2 * H]
            o_g = sig[:, 3 * H:4 * H]
            g_g = jnp.tanh(gates[:, 2 * H:3 * H])  # tanh only on the g gate
            c = f_g * c + i_g * g_g
            h = o_g * jnp.tanh(c)
            # Merge h into the register-carried sequence; off the h/c
            # recurrence critical path (never feeds back into h or c).
            hs = jnp.where(row_ids == t, h, hs)

    # Inter-layer LSTM dropout and self.dropout are identity at inference.
    # Final Linear on the last layer's hidden sequence, lane-dense store.
    out_ref[...] = (jnp.dot(hs.astype(jnp.bfloat16), wfc_ref[...],
                            preferred_element_type=jnp.float32)
                    + bfc_ref[...]).astype(out_ref.dtype)


def init_params(key, input_size, hidden_size, num_layers, output_size):
    """PyTorch-style uniform(-1/sqrt(H), 1/sqrt(H)) init, raw torch layout, f32."""
    H, I, L, O = hidden_size, input_size, num_layers, output_size
    bound = 1.0 / float(H) ** 0.5
    keys = jax.random.split(key, 4 * L + 2)
    layers = []
    for l in range(L):
        in_dim = I if l == 0 else H
        w_ih = jax.random.uniform(keys[4 * l + 0], (4 * H, in_dim),
                                  minval=-bound, maxval=bound)
        w_hh = jax.random.uniform(keys[4 * l + 1], (4 * H, H),
                                  minval=-bound, maxval=bound)
        b_ih = jax.random.uniform(keys[4 * l + 2], (4 * H,),
                                  minval=-bound, maxval=bound)
        b_hh = jax.random.uniform(keys[4 * l + 3], (4 * H,),
                                  minval=-bound, maxval=bound)
        layers.append((w_ih, w_hh, b_ih, b_hh))
    w_fc = jax.random.uniform(keys[-2], (O, H), minval=-bound, maxval=bound)
    b_fc = jax.random.uniform(keys[-1], (O,), minval=-bound, maxval=bound)
    return {"layers": layers, "w_fc": w_fc, "b_fc": b_fc}


def _pack_params(raw, hidden_size, num_layers, output_size):
    """Transpose / pad / bf16-cast raw params into kernel layout."""
    H, L, O = hidden_size, num_layers, output_size
    OP = ((O + 127) // 128) * 128                  # lane-dense output width

    w_ih0 = raw["layers"][0][0]                    # (4H, I)
    wih0 = w_ih0.T.astype(jnp.bfloat16)            # (I, 4H)

    wihr_list = [raw["layers"][l][0].T for l in range(1, L)]   # each (H, 4H)
    if wihr_list:
        wihr = jnp.stack(wihr_list).astype(jnp.bfloat16)       # (L-1, H, 4H)
    else:
        wihr = jnp.zeros((1, H, 4 * H), jnp.bfloat16)          # dummy (unused)

    whh = jnp.stack([raw["layers"][l][1].T for l in range(L)]
                    ).astype(jnp.bfloat16)                      # (L, H, 4H)
    b = jnp.stack([(raw["layers"][l][2] + raw["layers"][l][3])[None, :]
                   for l in range(L)]).astype(jnp.float32)      # (L, 1, 4H)

    wfc = jnp.zeros((H, OP), jnp.float32).at[:, :O].set(
        raw["w_fc"].T).astype(jnp.bfloat16)                     # (H, OP)
    bfc = jnp.zeros((1, OP), jnp.float32).at[0, :O].set(
        raw["b_fc"])                                            # (1, OP)
    return wih0, wihr, whh, b, wfc, bfc, OP


def lstm_model_forward(x, raw_params, *, hidden_size, num_layers, output_size):
    """x: (seq_len, 1, input_size)  ->  (seq_len, 1, output_size)"""
    T, B, I = x.shape
    assert B == 1, "module hard-codes batch=1 via h0/c0 shapes"
    H, L, O = hidden_size, num_layers, output_size

    wih0, wihr, whh, b, wfc, bfc, OP = _pack_params(raw_params, H, L, O)

    x2 = x[:, 0, :].astype(jnp.bfloat16)           # (T, I)

    kernel = functools.partial(_lstm_kernel, num_layers=L, hidden_size=H,
                               seq_len=T)

    Lr = max(L - 1, 1)
    # NOTE: grid has a single step, so input double-buffering is moot at this
    # size; at scaled H the weight specs would be the first VMEM concern.
    out2 = pl.pallas_call(
        kernel,
        out_shape=jax.ShapeDtypeStruct((T, OP), jnp.float32),
        grid=(1,),
        in_specs=[
            pl.BlockSpec((T, I), lambda i: (0, 0)),
            pl.BlockSpec((I, 4 * H), lambda i: (0, 0)),
            pl.BlockSpec((Lr, H, 4 * H), lambda i: (0, 0, 0)),
            pl.BlockSpec((L, H, 4 * H), lambda i: (0, 0, 0)),
            pl.BlockSpec((L, 1, 4 * H), lambda i: (0, 0, 0)),
            pl.BlockSpec((H, OP), lambda i: (0, 0)),
            pl.BlockSpec((1, OP), lambda i: (0, 0)),
        ],
        out_specs=pl.BlockSpec((T, OP), lambda i: (0, 0)),
        compiler_params=pltpu.CompilerParams(
            dimension_semantics=("arbitrary",)),
    )(x2, wih0, wihr, whh, b, wfc, bfc)

    return out2[:, :O][:, None, :]                 # (seq, 1, output_size)


def lstm_model_reference(x, raw, *, hidden_size, num_layers):
    """Pure-JAX f32 reference matching PyTorch nn.LSTM + Linear (eval mode)."""
    H, L = hidden_size, num_layers
    T = x.shape[0]
    seq = x[:, 0, :].astype(jnp.float32)
    for l in range(L):
        w_ih, w_hh, b_ih, b_hh = raw["layers"][l]
        h = jnp.zeros((H,), jnp.float32)
        c = jnp.zeros((H,), jnp.float32)
        outs = []
        for t in range(T):
            g = w_ih @ seq[t] + b_ih + w_hh @ h + b_hh
            i = jax.nn.sigmoid(g[0:H])
            f = jax.nn.sigmoid(g[H:2 * H])
            gg = jnp.tanh(g[2 * H:3 * H])
            o = jax.nn.sigmoid(g[3 * H:4 * H])
            c = f * c + i * gg
            h = o * jnp.tanh(c)
            outs.append(h)
        seq = jnp.stack(outs, axis=0)
    out = seq @ raw["w_fc"].T + raw["b_fc"]
    return out[:, None, :]


if __name__ == "__main__":
    SEQ_LEN = 8
    INPUT_SIZE = 16
    HIDDEN_SIZE = 32
    NUM_LAYERS = 2
    OUTPUT_SIZE = 8

    key = jax.random.PRNGKey(0)
    k_x, k_p = jax.random.split(key)

    x = jax.random.normal(k_x, (SEQ_LEN, 1, INPUT_SIZE), dtype=jnp.float32)
    params = init_params(k_p, INPUT_SIZE, HIDDEN_SIZE, NUM_LAYERS, OUTPUT_SIZE)

    out = lstm_model_forward(x, params,
                             hidden_size=HIDDEN_SIZE,
                             num_layers=NUM_LAYERS,
                             output_size=OUTPUT_SIZE)
    jax.block_until_ready(out)
    assert out.shape == (SEQ_LEN, 1, OUTPUT_SIZE)
    assert bool(jnp.all(jnp.isfinite(out)))

    # Validate against the pure f32 reference (bf16 matmuls => loose tolerance).
    ref = lstm_model_reference(x, params,
                               hidden_size=HIDDEN_SIZE, num_layers=NUM_LAYERS)
    max_err = float(jnp.max(jnp.abs(out - ref)))
    assert max_err < 0.1, f"kernel deviates from reference: max_err={max_err}"

    print("KERNEL_OK")
</pallas_src>

<mosaic_0001>
module attributes {stable_mosaic.version = 11 : i64} {
  func.func @_lstm_kernel(%arg0: i32, %arg1: memref<8x16xbf16, #tpu.memory_space<vmem>>, %arg2: memref<16x128xbf16, #tpu.memory_space<vmem>>, %arg3: memref<1x32x128xbf16, #tpu.memory_space<vmem>>, %arg4: memref<2x32x128xbf16, #tpu.memory_space<vmem>>, %arg5: memref<2x1x128xf32, #tpu.memory_space<vmem>>, %arg6: memref<32x128xbf16, #tpu.memory_space<vmem>>, %arg7: memref<1x128xf32, #tpu.memory_space<vmem>>, %arg8: memref<8x128xf32, #tpu.memory_space<vmem>>) attributes {dimension_semantics = [#tpu.dimension_semantics<arbitrary>], iteration_bounds = array<i64: 1>, scalar_prefetch = 0 : i64, scratch_operands = 0 : i64, tpu.core_type = #tpu.core_type<tc>, window_params = [{pipeline_mode = #tpu.pipeline_mode<synchronous>, transform_indices = @transform_0, window_bounds = array<i64: 8, 16>}, {pipeline_mode = #tpu.pipeline_mode<synchronous>, transform_indices = @transform_1, window_bounds = array<i64: 16, 128>}, {pipeline_mode = #tpu.pipeline_mode<synchronous>, transform_indices = @transform_2, window_bounds = array<i64: 1, 32, 128>}, {pipeline_mode = #tpu.pipeline_mode<synchronous>, transform_indices = @transform_3, window_bounds = array<i64: 2, 32, 128>}, {pipeline_mode = #tpu.pipeline_mode<synchronous>, transform_indices = @transform_4, window_bounds = array<i64: 2, 1, 128>}, {pipeline_mode = #tpu.pipeline_mode<synchronous>, transform_indices = @transform_5, window_bounds = array<i64: 32, 128>}, {pipeline_mode = #tpu.pipeline_mode<synchronous>, transform_indices = @transform_6, window_bounds = array<i64: 1, 128>}, {pipeline_mode = #tpu.pipeline_mode<synchronous>, transform_indices = @transform_7, window_bounds = array<i64: 8, 128>}]} {
    %0 = tpu.iota {dimensions = array<i32: 0>} : vector<8x1xi32>
    %c0 = arith.constant 0 : index
    %c0_0 = arith.constant 0 : index
    %1 = vector.load %arg1[%c0, %c0_0] : memref<8x16xbf16, #tpu.memory_space<vmem>>, vector<8x16xbf16>
    %c0_1 = arith.constant 0 : index
    %c0_2 = arith.constant 0 : index
    %2 = vector.load %arg2[%c0_1, %c0_2] : memref<16x128xbf16, #tpu.memory_space<vmem>>, vector<16x128xbf16>
    %cst = arith.constant dense<0.000000e+00> : vector<8x128xf32>
    %3 = tpu.matmul %1, %2, %cst {dimension_numbers = #tpu.dot_dimension_numbers<[1], [0], [0], [1], [0, 0, 1, 1], [], []>} : vector<8x16xbf16>, vector<16x128xbf16>, vector<8x128xf32> -> vector<8x128xf32>
    %c0_3 = arith.constant 0 : index
    %c0_4 = arith.constant 0 : index
    %c0_5 = arith.constant 0 : index
    %4 = vector.load %arg5[%c0_3, %c0_4, %c0_5] : memref<2x1x128xf32, #tpu.memory_space<vmem>>, vector<1x1x128xf32>
    %5 = vector.shape_cast %4 : vector<1x1x128xf32> to vector<1x128xf32>
    %6 = vector.broadcast %5 : vector<1x128xf32> to vector<8x128xf32>
    %7 = arith.addf %3, %6 : vector<8x128xf32>
    %c0_6 = arith.constant 0 : index
    %c0_7 = arith.constant 0 : index
    %c0_8 = arith.constant 0 : index
    %8 = vector.load %arg4[%c0_6, %c0_7, %c0_8] : memref<2x32x128xbf16, #tpu.memory_space<vmem>>, vector<1x32x128xbf16>
    %9 = vector.shape_cast %8 : vector<1x32x128xbf16> to vector<32x128xbf16>
    %cst_9 = arith.constant 0.000000e+00 : f32
    %10 = vector.broadcast %cst_9 : f32 to vector<1x32xf32>
    %cst_10 = arith.constant 0.000000e+00 : f32
    %11 = vector.broadcast %cst_10 : f32 to vector<1x32xf32>
    %cst_11 = arith.constant 0.000000e+00 : f32
    %12 = vector.broadcast %cst_11 : f32 to vector<8x32xf32>
    %13 = vector.extract_strided_slice %7 {offsets = [0, 0], sizes = [1, 128], strides = [1, 1]} : vector<8x128xf32> to vector<1x128xf32>
    %14 = arith.truncf %10 : vector<1x32xf32> to vector<1x32xbf16>
    %cst_12 = arith.constant dense<0.000000e+00> : vector<1x128xf32>
    %15 = tpu.matmul %14, %9, %cst_12 {dimension_numbers = #tpu.dot_dimension_numbers<[1], [0], [0], [1], [0, 0, 1, 1], [], []>} : vector<1x32xbf16>, vector<32x128xbf16>, vector<1x128xf32> -> vector<1x128xf32>
    %16 = arith.addf %13, %15 : vector<1x128xf32>
    %17 = arith.negf %16 : vector<1x128xf32>
    %18 = math.exp %17 : vector<1x128xf32>
    %cst_13 = arith.constant 1.000000e+00 : f32
    %19 = vector.broadcast %cst_13 : f32 to vector<1x128xf32>
    %20 = arith.addf %19, %18 : vector<1x128xf32>
    %21 = arith.divf %19, %20 : vector<1x128xf32>
    %22 = vector.extract_strided_slice %21 {offsets = [0, 0], sizes = [1, 32], strides = [1, 1]} : vector<1x128xf32> to vector<1x32xf32>
    %23 = vector.extract_strided_slice %21 {offsets = [0, 32], sizes = [1, 32], strides = [1, 1]} : vector<1x128xf32> to vector<1x32xf32>
    %24 = vector.extract_strided_slice %21 {offsets = [0, 96], sizes = [1, 32], strides = [1, 1]} : vector<1x128xf32> to vector<1x32xf32>
    %25 = vector.extract_strided_slice %16 {offsets = [0, 64], sizes = [1, 32], strides = [1, 1]} : vector<1x128xf32> to vector<1x32xf32>
    %26 = math.tanh %25 : vector<1x32xf32>
    %27 = arith.mulf %23, %11 : vector<1x32xf32>
    %28 = arith.mulf %22, %26 : vector<1x32xf32>
    %29 = arith.addf %27, %28 : vector<1x32xf32>
    %30 = math.tanh %29 : vector<1x32xf32>
    %31 = arith.mulf %24, %30 : vector<1x32xf32>
    %c0_i32 = arith.constant 0 : i32
    %32 = vector.broadcast %c0_i32 : i32 to vector<8x1xi32>
    %33 = arith.cmpi eq, %0, %32 : vector<8x1xi32>
    %34 = vector.shape_cast %33 : vector<8x1xi1> to vector<8x1xi1>
    %35 = vector.broadcast %34 : vector<8x1xi1> to vector<8x32xi1>
    %36 = vector.shape_cast %31 : vector<1x32xf32> to vector<1x32xf32>
    %37 = vector.broadcast %36 : vector<1x32xf32> to vector<8x32xf32>
    %38 = arith.select %35, %37, %12 : vector<8x32xi1>, vector<8x32xf32>
    %39 = vector.extract_strided_slice %7 {offsets = [1, 0], sizes = [1, 128], strides = [1, 1]} : vector<8x128xf32> to vector<1x128xf32>
    %40 = arith.truncf %31 : vector<1x32xf32> to vector<1x32xbf16>
    %cst_14 = arith.constant dense<0.000000e+00> : vector<1x128xf32>
    %41 = tpu.matmul %40, %9, %cst_14 {dimension_numbers = #tpu.dot_dimension_numbers<[1], [0], [0], [1], [0, 0, 1, 1], [], []>} : vector<1x32xbf16>, vector<32x128xbf16>, vector<1x128xf32> -> vector<1x128xf32>
    %42 = arith.addf %39, %41 : vector<1x128xf32>
    %43 = arith.negf %42 : vector<1x128xf32>
    %44 = math.exp %43 : vector<1x128xf32>
    %cst_15 = arith.constant 1.000000e+00 : f32
    %45 = vector.broadcast %cst_15 : f32 to vector<1x128xf32>
    %46 = arith.addf %45, %44 : vector<1x128xf32>
    %47 = arith.divf %45, %46 : vector<1x128xf32>
    %48 = vector.extract_strided_slice %47 {offsets = [0, 0], sizes = [1, 32], strides = [1, 1]} : vector<1x128xf32> to vector<1x32xf32>
    %49 = vector.extract_strided_slice %47 {offsets = [0, 32], sizes = [1, 32], strides = [1, 1]} : vector<1x128xf32> to vector<1x32xf32>
    %50 = vector.extract_strided_slice %47 {offsets = [0, 96], sizes = [1, 32], strides = [1, 1]} : vector<1x128xf32> to vector<1x32xf32>
    %51 = vector.extract_strided_slice %42 {offsets = [0, 64], sizes = [1, 32], strides = [1, 1]} : vector<1x128xf32> to vector<1x32xf32>
    %52 = math.tanh %51 : vector<1x32xf32>
    %53 = arith.mulf %49, %29 : vector<1x32xf32>
    %54 = arith.mulf %48, %52 : vector<1x32xf32>
    %55 = arith.addf %53, %54 : vector<1x32xf32>
    %56 = math.tanh %55 : vector<1x32xf32>
    %57 = arith.mulf %50, %56 : vector<1x32xf32>
    %c1_i32 = arith.constant 1 : i32
    %58 = vector.broadcast %c1_i32 : i32 to vector<8x1xi32>
    %59 = arith.cmpi eq, %0, %58 : vector<8x1xi32>
    %60 = vector.shape_cast %59 : vector<8x1xi1> to vector<8x1xi1>
    %61 = vector.broadcast %60 : vector<8x1xi1> to vector<8x32xi1>
    %62 = vector.shape_cast %57 : vector<1x32xf32> to vector<1x32xf32>
    %63 = vector.broadcast %62 : vector<1x32xf32> to vector<8x32xf32>
    %64 = arith.select %61, %63, %38 : vector<8x32xi1>, vector<8x32xf32>
    %65 = vector.extract_strided_slice %7 {offsets = [2, 0], sizes = [1, 128], strides = [1, 1]} : vector<8x128xf32> to vector<1x128xf32>
    %66 = arith.truncf %57 : vector<1x32xf32> to vector<1x32xbf16>
    %cst_16 = arith.constant dense<0.000000e+00> : vector<1x128xf32>
    %67 = tpu.matmul %66, %9, %cst_16 {dimension_numbers = #tpu.dot_dimension_numbers<[1], [0], [0], [1], [0, 0, 1, 1], [], []>} : vector<1x32xbf16>, vector<32x128xbf16>, vector<1x128xf32> -> vector<1x128xf32>
    %68 = arith.addf %65, %67 : vector<1x128xf32>
    %69 = arith.negf %68 : vector<1x128xf32>
    %70 = math.exp %69 : vector<1x128xf32>
    %cst_17 = arith.constant 1.000000e+00 : f32
    %71 = vector.broadcast %cst_17 : f32 to vector<1x128xf32>
    %72 = arith.addf %71, %70 : vector<1x128xf32>
    %73 = arith.divf %71, %72 : vector<1x128xf32>
    %74 = vector.extract_strided_slice %73 {offsets = [0, 0], sizes = [1, 32], strides = [1, 1]} : vector<1x128xf32> to vector<1x32xf32>
    %75 = vector.extract_strided_slice %73 {offsets = [0, 32], sizes = [1, 32], strides = [1, 1]} : vector<1x128xf32> to vector<1x32xf32>
    %76 = vector.extract_strided_slice %73 {offsets = [0, 96], sizes = [1, 32], strides = [1, 1]} : vector<1x128xf32> to vector<1x32xf32>
    %77 = vector.extract_strided_slice %68 {offsets = [0, 64], sizes = [1, 32], strides = [1, 1]} : vector<1x128xf32> to vector<1x32xf32>
    %78 = math.tanh %77 : vector<1x32xf32>
    %79 = arith.mulf %75, %55 : vector<1x32xf32>
    %80 = arith.mulf %74, %78 : vector<1x32xf32>
    %81 = arith.addf %79, %80 : vector<1x32xf32>
    %82 = math.tanh %81 : vector<1x32xf32>
    %83 = arith.mulf %76, %82 : vector<1x32xf32>
    %c2_i32 = arith.constant 2 : i32
    %84 = vector.broadcast %c2_i32 : i32 to vector<8x1xi32>
    %85 = arith.cmpi eq, %0, %84 : vector<8x1xi32>
    %86 = vector.shape_cast %85 : vector<8x1xi1> to vector<8x1xi1>
    %87 = vector.broadcast %86 : vector<8x1xi1> to vector<8x32xi1>
    %88 = vector.shape_cast %83 : vector<1x32xf32> to vector<1x32xf32>
    %89 = vector.broadcast %88 : vector<1x32xf32> to vector<8x32xf32>
    %90 = arith.select %87, %89, %64 : vector<8x32xi1>, vector<8x32xf32>
    %91 = vector.extract_strided_slice %7 {offsets = [3, 0], sizes = [1, 128], strides = [1, 1]} : vector<8x128xf32> to vector<1x128xf32>
    %92 = arith.truncf %83 : vector<1x32xf32> to vector<1x32xbf16>
    %cst_18 = arith.constant dense<0.000000e+00> : vector<1x128xf32>
    %93 = tpu.matmul %92, %9, %cst_18 {dimension_numbers = #tpu.dot_dimension_numbers<[1], [0], [0], [1], [0, 0, 1, 1], [], []>} : vector<1x32xbf16>, vector<32x128xbf16>, vector<1x128xf32> -> vector<1x128xf32>
    %94 = arith.addf %91, %93 : vector<1x128xf32>
    %95 = arith.negf %94 : vector<1x128xf32>
    %96 = math.exp %95 : vector<1x128xf32>
    %cst_19 = arith.constant 1.000000e+00 : f32
    %97 = vector.broadcast %cst_19 : f32 to vector<1x128xf32>
    %98 = arith.addf %97, %96 : vector<1x128xf32>
    %99 = arith.divf %97, %98 : vector<1x128xf32>
    %100 = vector.extract_strided_slice %99 {offsets = [0, 0], sizes = [1, 32], strides = [1, 1]} : vector<1x128xf32> to vector<1x32xf32>
    %101 = vector.extract_strided_slice %99 {offsets = [0, 32], sizes = [1, 32], strides = [1, 1]} : vector<1x128xf32> to vector<1x32xf32>
    %102 = vector.extract_strided_slice %99 {offsets = [0, 96], sizes = [1, 32], strides = [1, 1]} : vector<1x128xf32> to vector<1x32xf32>
    %103 = vector.extract_strided_slice %94 {offsets = [0, 64], sizes = [1, 32], strides = [1, 1]} : vector<1x128xf32> to vector<1x32xf32>
    %104 = math.tanh %103 : vector<1x32xf32>
    %105 = arith.mulf %101, %81 : vector<1x32xf32>
    %106 = arith.mulf %100, %104 : vector<1x32xf32>
    %107 = arith.addf %105, %106 : vector<1x32xf32>
    %108 = math.tanh %107 : vector<1x32xf32>
    %109 = arith.mulf %102, %108 : vector<1x32xf32>
    %c3_i32 = arith.constant 3 : i32
    %110 = vector.broadcast %c3_i32 : i32 to vector<8x1xi32>
    %111 = arith.cmpi eq, %0, %110 : vector<8x1xi32>
    %112 = vector.shape_cast %111 : vector<8x1xi1> to vector<8x1xi1>
    %113 = vector.broadcast %112 : vector<8x1xi1> to vector<8x32xi1>
    %114 = vector.shape_cast %109 : vector<1x32xf32> to vector<1x32xf32>
    %115 = vector.broadcast %114 : vector<1x32xf32> to vector<8x32xf32>
    %116 = arith.select %113, %115, %90 : vector<8x32xi1>, vector<8x32xf32>
    %117 = vector.extract_strided_slice %7 {offsets = [4, 0], sizes = [1, 128], strides = [1, 1]} : vector<8x128xf32> to vector<1x128xf32>
    %118 = arith.truncf %109 : vector<1x32xf32> to vector<1x32xbf16>
    %cst_20 = arith.constant dense<0.000000e+00> : vector<1x128xf32>
    %119 = tpu.matmul %118, %9, %cst_20 {dimension_numbers = #tpu.dot_dimension_numbers<[1], [0], [0], [1], [0, 0, 1, 1], [], []>} : vector<1x32xbf16>, vector<32x128xbf16>, vector<1x128xf32> -> vector<1x128xf32>
    %120 = arith.addf %117, %119 : vector<1x128xf32>
    %121 = arith.negf %120 : vector<1x128xf32>
    %122 = math.exp %121 : vector<1x128xf32>
    %cst_21 = arith.constant 1.000000e+00 : f32
    %123 = vector.broadcast %cst_21 : f32 to vector<1x128xf32>
    %124 = arith.addf %123, %122 : vector<1x128xf32>
    %125 = arith.divf %123, %124 : vector<1x128xf32>
    %126 = vector.extract_strided_slice %125 {offsets = [0, 0], sizes = [1, 32], strides = [1, 1]} : vector<1x128xf32> to vector<1x32xf32>
    %127 = vector.extract_strided_slice %125 {offsets = [0, 32], sizes = [1, 32], strides = [1, 1]} : vector<1x128xf32> to vector<1x32xf32>
    %128 = vector.extract_strided_slice %125 {offsets = [0, 96], sizes = [1, 32], strides = [1, 1]} : vector<1x128xf32> to vector<1x32xf32>
    %129 = vector.extract_strided_slice %120 {offsets = [0, 64], sizes = [1, 32], strides = [1, 1]} : vector<1x128xf32> to vector<1x32xf32>
    %130 = math.tanh %129 : vector<1x32xf32>
    %131 = arith.mulf %127, %107 : vector<1x32xf32>
    %132 = arith.mulf %126, %130 : vector<1x32xf32>
    %133 = arith.addf %131, %132 : vector<1x32xf32>
    %134 = math.tanh %133 : vector<1x32xf32>
    %135 = arith.mulf %128, %134 : vector<1x32xf32>
    %c4_i32 = arith.constant 4 : i32
    %136 = vector.broadcast %c4_i32 : i32 to vector<8x1xi32>
    %137 = arith.cmpi eq, %0, %136 : vector<8x1xi32>
    %138 = vector.shape_cast %137 : vector<8x1xi1> to vector<8x1xi1>
    %139 = vector.broadcast %138 : vector<8x1xi1> to vector<8x32xi1>
    %140 = vector.shape_cast %135 : vector<1x32xf32> to vector<1x32xf32>
    %141 = vector.broadcast %140 : vector<1x32xf32> to vector<8x32xf32>
    %142 = arith.select %139, %141, %116 : vector<8x32xi1>, vector<8x32xf32>
    %143 = vector.extract_strided_slice %7 {offsets = [5, 0], sizes = [1, 128], strides = [1, 1]} : vector<8x128xf32> to vector<1x128xf32>
    %144 = arith.truncf %135 : vector<1x32xf32> to vector<1x32xbf16>
    %cst_22 = arith.constant dense<0.000000e+00> : vector<1x128xf32>
    %145 = tpu.matmul %144, %9, %cst_22 {dimension_numbers = #tpu.dot_dimension_numbers<[1], [0], [0], [1], [0, 0, 1, 1], [], []>} : vector<1x32xbf16>, vector<32x128xbf16>, vector<1x128xf32> -> vector<1x128xf32>
    %146 = arith.addf %143, %145 : vector<1x128xf32>
    %147 = arith.negf %146 : vector<1x128xf32>
    %148 = math.exp %147 : vector<1x128xf32>
    %cst_23 = arith.constant 1.000000e+00 : f32
    %149 = vector.broadcast %cst_23 : f32 to vector<1x128xf32>
    %150 = arith.addf %149, %148 : vector<1x128xf32>
    %151 = arith.divf %149, %150 : vector<1x128xf32>
    %152 = vector.extract_strided_slice %151 {offsets = [0, 0], sizes = [1, 32], strides = [1, 1]} : vector<1x128xf32> to vector<1x32xf32>
    %153 = vector.extract_strided_slice %151 {offsets = [0, 32], sizes = [1, 32], strides = [1, 1]} : vector<1x128xf32> to vector<1x32xf32>
    %154 = vector.extract_strided_slice %151 {offsets = [0, 96], sizes = [1, 32], strides = [1, 1]} : vector<1x128xf32> to vector<1x32xf32>
    %155 = vector.extract_strided_slice %146 {offsets = [0, 64], sizes = [1, 32], strides = [1, 1]} : vector<1x128xf32> to vector<1x32xf32>
    %156 = math.tanh %155 : vector<1x32xf32>
    %157 = arith.mulf %153, %133 : vector<1x32xf32>
    %158 = arith.mulf %152, %156 : vector<1x32xf32>
    %159 = arith.addf %157, %158 : vector<1x32xf32>
    %160 = math.tanh %159 : vector<1x32xf32>
    %161 = arith.mulf %154, %160 : vector<1x32xf32>
    %c5_i32 = arith.constant 5 : i32
    %162 = vector.broadcast %c5_i32 : i32 to vector<8x1xi32>
    %163 = arith.cmpi eq, %0, %162 : vector<8x1xi32>
    %164 = vector.shape_cast %163 : vector<8x1xi1> to vector<8x1xi1>
    %165 = vector.broadcast %164 : vector<8x1xi1> to vector<8x32xi1>
    %166 = vector.shape_cast %161 : vector<1x32xf32> to vector<1x32xf32>
    %167 = vector.broadcast %166 : vector<1x32xf32> to vector<8x32xf32>
    %168 = arith.select %165, %167, %142 : vector<8x32xi1>, vector<8x32xf32>
    %169 = vector.extract_strided_slice %7 {offsets = [6, 0], sizes = [1, 128], strides = [1, 1]} : vector<8x128xf32> to vector<1x128xf32>
    %170 = arith.truncf %161 : vector<1x32xf32> to vector<1x32xbf16>
    %cst_24 = arith.constant dense<0.000000e+00> : vector<1x128xf32>
    %171 = tpu.matmul %170, %9, %cst_24 {dimension_numbers = #tpu.dot_dimension_numbers<[1], [0], [0], [1], [0, 0, 1, 1], [], []>} : vector<1x32xbf16>, vector<32x128xbf16>, vector<1x128xf32> -> vector<1x128xf32>
    %172 = arith.addf %169, %171 : vector<1x128xf32>
    %173 = arith.negf %172 : vector<1x128xf32>
    %174 = math.exp %173 : vector<1x128xf32>
    %cst_25 = arith.constant 1.000000e+00 : f32
    %175 = vector.broadcast %cst_25 : f32 to vector<1x128xf32>
    %176 = arith.addf %175, %174 : vector<1x128xf32>
    %177 = arith.divf %175, %176 : vector<1x128xf32>
    %178 = vector.extract_strided_slice %177 {offsets = [0, 0], sizes = [1, 32], strides = [1, 1]} : vector<1x128xf32> to vector<1x32xf32>
    %179 = vector.extract_strided_slice %177 {offsets = [0, 32], sizes = [1, 32], strides = [1, 1]} : vector<1x128xf32> to vector<1x32xf32>
    %180 = vector.extract_strided_slice %177 {offsets = [0, 96], sizes = [1, 32], strides = [1, 1]} : vector<1x128xf32> to vector<1x32xf32>
    %181 = vector.extract_strided_slice %172 {offsets = [0, 64], sizes = [1, 32], strides = [1, 1]} : vector<1x128xf32> to vector<1x32xf32>
    %182 = math.tanh %181 : vector<1x32xf32>
    %183 = arith.mulf %179, %159 : vector<1x32xf32>
    %184 = arith.mulf %178, %182 : vector<1x32xf32>
    %185 = arith.addf %183, %184 : vector<1x32xf32>
    %186 = math.tanh %185 : vector<1x32xf32>
    %187 = arith.mulf %180, %186 : vector<1x32xf32>
    %c6_i32 = arith.constant 6 : i32
    %188 = vector.broadcast %c6_i32 : i32 to vector<8x1xi32>
    %189 = arith.cmpi eq, %0, %188 : vector<8x1xi32>
    %190 = vector.shape_cast %189 : vector<8x1xi1> to vector<8x1xi1>
    %191 = vector.broadcast %190 : vector<8x1xi1> to vector<8x32xi1>
    %192 = vector.shape_cast %187 : vector<1x32xf32> to vector<1x32xf32>
    %193 = vector.broadcast %192 : vector<1x32xf32> to vector<8x32xf32>
    %194 = arith.select %191, %193, %168 : vector<8x32xi1>, vector<8x32xf32>
    %195 = vector.extract_strided_slice %7 {offsets = [7, 0], sizes = [1, 128], strides = [1, 1]} : vector<8x128xf32> to vector<1x128xf32>
    %196 = arith.truncf %187 : vector<1x32xf32> to vector<1x32xbf16>
    %cst_26 = arith.constant dense<0.000000e+00> : vector<1x128xf32>
    %197 = tpu.matmul %196, %9, %cst_26 {dimension_numbers = #tpu.dot_dimension_numbers<[1], [0], [0], [1], [0, 0, 1, 1], [], []>} : vector<1x32xbf16>, vector<32x128xbf16>, vector<1x128xf32> -> vector<1x128xf32>
    %198 = arith.addf %195, %197 : vector<1x128xf32>
    %199 = arith.negf %198 : vector<1x128xf32>
    %200 = math.exp %199 : vector<1x128xf32>
    %cst_27 = arith.constant 1.000000e+00 : f32
    %201 = vector.broadcast %cst_27 : f32 to vector<1x128xf32>
    %202 = arith.addf %201, %200 : vector<1x128xf32>
    %203 = arith.divf %201, %202 : vector<1x128xf32>
    %204 = vector.extract_strided_slice %203 {offsets = [0, 0], sizes = [1, 32], strides = [1, 1]} : vector<1x128xf32> to vector<1x32xf32>
    %205 = vector.extract_strided_slice %203 {offsets = [0, 32], sizes = [1, 32], strides = [1, 1]} : vector<1x128xf32> to vector<1x32xf32>
    %206 = vector.extract_strided_slice %203 {offsets = [0, 96], sizes = [1, 32], strides = [1, 1]} : vector<1x128xf32> to vector<1x32xf32>
    %207 = vector.extract_strided_slice %198 {offsets = [0, 64], sizes = [1, 32], strides = [1, 1]} : vector<1x128xf32> to vector<1x32xf32>
    %208 = math.tanh %207 : vector<1x32xf32>
    %209 = arith.mulf %205, %185 : vector<1x32xf32>
    %210 = arith.mulf %204, %208 : vector<1x32xf32>
    %211 = arith.addf %209, %210 : vector<1x32xf32>
    %212 = math.tanh %211 : vector<1x32xf32>
    %213 = arith.mulf %206, %212 : vector<1x32xf32>
    %c7_i32 = arith.constant 7 : i32
    %214 = vector.broadcast %c7_i32 : i32 to vector<8x1xi32>
    %215 = arith.cmpi eq, %0, %214 : vector<8x1xi32>
    %216 = vector.shape_cast %215 : vector<8x1xi1> to vector<8x1xi1>
    %217 = vector.broadcast %216 : vector<8x1xi1> to vector<8x32xi1>
    %218 = vector.shape_cast %213 : vector<1x32xf32> to vector<1x32xf32>
    %219 = vector.broadcast %218 : vector<1x32xf32> to vector<8x32xf32>
    %220 = arith.select %217, %219, %194 : vector<8x32xi1>, vector<8x32xf32>
    %221 = arith.truncf %220 : vector<8x32xf32> to vector<8x32xbf16>
    %c0_28 = arith.constant 0 : index
    %c0_29 = arith.constant 0 : index
    %c0_30 = arith.constant 0 : index
    %222 = vector.load %arg3[%c0_28, %c0_29, %c0_30] : memref<1x32x128xbf16, #tpu.memory_space<vmem>>, vector<1x32x128xbf16>
    %223 = vector.shape_cast %222 : vector<1x32x128xbf16> to vector<32x128xbf16>
    %cst_31 = arith.constant dense<0.000000e+00> : vector<8x128xf32>
    %224 = tpu.matmul %221, %223, %cst_31 {dimension_numbers = #tpu.dot_dimension_numbers<[1], [0], [0], [1], [0, 0, 1, 1], [], []>} : vector<8x32xbf16>, vector<32x128xbf16>, vector<8x128xf32> -> vector<8x128xf32>
    %c1 = arith.constant 1 : index
    %c0_32 = arith.constant 0 : index
    %c0_33 = arith.constant 0 : index
    %225 = vector.load %arg5[%c1, %c0_32, %c0_33] : memref<2x1x128xf32, #tpu.memory_space<vmem>>, vector<1x1x128xf32>
    %226 = vector.shape_cast %225 : vector<1x1x128xf32> to vector<1x128xf32>
    %227 = vector.broadcast %226 : vector<1x128xf32> to vector<8x128xf32>
    %228 = arith.addf %224, %227 : vector<8x128xf32>
    %c1_34 = arith.constant 1 : index
    %c0_35 = arith.constant 0 : index
    %c0_36 = arith.constant 0 : index
    %229 = vector.load %arg4[%c1_34, %c0_35, %c0_36] : memref<2x32x128xbf16, #tpu.memory_space<vmem>>, vector<1x32x128xbf16>
    %230 = vector.shape_cast %229 : vector<1x32x128xbf16> to vector<32x128xbf16>
    %cst_37 = arith.constant 0.000000e+00 : f32
    %231 = vector.broadcast %cst_37 : f32 to vector<1x32xf32>
    %cst_38 = arith.constant 0.000000e+00 : f32
    %232 = vector.broadcast %cst_38 : f32 to vector<1x32xf32>
    %cst_39 = arith.constant 0.000000e+00 : f32
    %233 = vector.broadcast %cst_39 : f32 to vector<8x32xf32>
    %234 = vector.extract_strided_slice %228 {offsets = [0, 0], sizes = [1, 128], strides = [1, 1]} : vector<8x128xf32> to vector<1x128xf32>
    %235 = arith.truncf %231 : vector<1x32xf32> to vector<1x32xbf16>
    %cst_40 = arith.constant dense<0.000000e+00> : vector<1x128xf32>
    %236 = tpu.matmul %235, %230, %cst_40 {dimension_numbers = #tpu.dot_dimension_numbers<[1], [0], [0], [1], [0, 0, 1, 1], [], []>} : vector<1x32xbf16>, vector<32x128xbf16>, vector<1x128xf32> -> vector<1x128xf32>
    %237 = arith.addf %234, %236 : vector<1x128xf32>
    %238 = arith.negf %237 : vector<1x128xf32>
    %239 = math.exp %238 : vector<1x128xf32>
    %cst_41 = arith.constant 1.000000e+00 : f32
    %240 = vector.broadcast %cst_41 : f32 to vector<1x128xf32>
    %241 = arith.addf %240, %239 : vector<1x128xf32>
    %242 = arith.divf %240, %241 : vector<1x128xf32>
    %243 = vector.extract_strided_slice %242 {offsets = [0, 0], sizes = [1, 32], strides = [1, 1]} : vector<1x128xf32> to vector<1x32xf32>
    %244 = vector.extract_strided_slice %242 {offsets = [0, 32], sizes = [1, 32], strides = [1, 1]} : vector<1x128xf32> to vector<1x32xf32>
    %245 = vector.extract_strided_slice %242 {offsets = [0, 96], sizes = [1, 32], strides = [1, 1]} : vector<1x128xf32> to vector<1x32xf32>
    %246 = vector.extract_strided_slice %237 {offsets = [0, 64], sizes = [1, 32], strides = [1, 1]} : vector<1x128xf32> to vector<1x32xf32>
    %247 = math.tanh %246 : vector<1x32xf32>
    %248 = arith.mulf %244, %232 : vector<1x32xf32>
    %249 = arith.mulf %243, %247 : vector<1x32xf32>
    %250 = arith.addf %248, %249 : vector<1x32xf32>
    %251 = math.tanh %250 : vector<1x32xf32>
    %252 = arith.mulf %245, %251 : vector<1x32xf32>
    %c0_i32_42 = arith.constant 0 : i32
    %253 = vector.broadcast %c0_i32_42 : i32 to vector<8x1xi32>
    %254 = arith.cmpi eq, %0, %253 : vector<8x1xi32>
    %255 = vector.shape_cast %254 : vector<8x1xi1> to vector<8x1xi1>
    %256 = vector.broadcast %255 : vector<8x1xi1> to vector<8x32xi1>
    %257 = vector.shape_cast %252 : vector<1x32xf32> to vector<1x32xf32>
    %258 = vector.broadcast %257 : vector<1x32xf32> to vector<8x32xf32>
    %259 = arith.select %256, %258, %233 : vector<8x32xi1>, vector<8x32xf32>
    %260 = vector.extract_strided_slice %228 {offsets = [1, 0], sizes = [1, 128], strides = [1, 1]} : vector<8x128xf32> to vector<1x128xf32>
    %261 = arith.truncf %252 : vector<1x32xf32> to vector<1x32xbf16>
    %cst_43 = arith.constant dense<0.000000e+00> : vector<1x128xf32>
    %262 = tpu.matmul %261, %230, %cst_43 {dimension_numbers = #tpu.dot_dimension_numbers<[1], [0], [0], [1], [0, 0, 1, 1], [], []>} : vector<1x32xbf16>, vector<32x128xbf16>, vector<1x128xf32> -> vector<1x128xf32>
    %263 = arith.addf %260, %262 : vector<1x128xf32>
    %264 = arith.negf %263 : vector<1x128xf32>
    %265 = math.exp %264 : vector<1x128xf32>
    %cst_44 = arith.constant 1.000000e+00 : f32
    %266 = vector.broadcast %cst_44 : f32 to vector<1x128xf32>
    %267 = arith.addf %266, %265 : vector<1x128xf32>
    %268 = arith.divf %266, %267 : vector<1x128xf32>
    %269 = vector.extract_strided_slice %268 {offsets = [0, 0], sizes = [1, 32], strides = [1, 1]} : vector<1x128xf32> to vector<1x32xf32>
    %270 = vector.extract_strided_slice %268 {offsets = [0, 32], sizes = [1, 32], strides = [1, 1]} : vector<1x128xf32> to vector<1x32xf32>
    %271 = vector.extract_strided_slice %268 {offsets = [0, 96], sizes = [1, 32], strides = [1, 1]} : vector<1x128xf32> to vector<1x32xf32>
    %272 = vector.extract_strided_slice %263 {offsets = [0, 64], sizes = [1, 32], strides = [1, 1]} : vector<1x128xf32> to vector<1x32xf32>
    %273 = math.tanh %272 : vector<1x32xf32>
    %274 = arith.mulf %270, %250 : vector<1x32xf32>
    %275 = arith.mulf %269, %273 : vector<1x32xf32>
    %276 = arith.addf %274, %275 : vector<1x32xf32>
    %277 = math.tanh %276 : vector<1x32xf32>
    %278 = arith.mulf %271, %277 : vector<1x32xf32>
    %c1_i32_45 = arith.constant 1 : i32
    %279 = vector.broadcast %c1_i32_45 : i32 to vector<8x1xi32>
    %280 = arith.cmpi eq, %0, %279 : vector<8x1xi32>
    %281 = vector.shape_cast %280 : vector<8x1xi1> to vector<8x1xi1>
    %282 = vector.broadcast %281 : vector<8x1xi1> to vector<8x32xi1>
    %283 = vector.shape_cast %278 : vector<1x32xf32> to vector<1x32xf32>
    %284 = vector.broadcast %283 : vector<1x32xf32> to vector<8x32xf32>
    %285 = arith.select %282, %284, %259 : vector<8x32xi1>, vector<8x32xf32>
    %286 = vector.extract_strided_slice %228 {offsets = [2, 0], sizes = [1, 128], strides = [1, 1]} : vector<8x128xf32> to vector<1x128xf32>
    %287 = arith.truncf %278 : vector<1x32xf32> to vector<1x32xbf16>
    %cst_46 = arith.constant dense<0.000000e+00> : vector<1x128xf32>
    %288 = tpu.matmul %287, %230, %cst_46 {dimension_numbers = #tpu.dot_dimension_numbers<[1], [0], [0], [1], [0, 0, 1, 1], [], []>} : vector<1x32xbf16>, vector<32x128xbf16>, vector<1x128xf32> -> vector<1x128xf32>
    %289 = arith.addf %286, %288 : vector<1x128xf32>
    %290 = arith.negf %289 : vector<1x128xf32>
    %291 = math.exp %290 : vector<1x128xf32>
    %cst_47 = arith.constant 1.000000e+00 : f32
    %292 = vector.broadcast %cst_47 : f32 to vector<1x128xf32>
    %293 = arith.addf %292, %291 : vector<1x128xf32>
    %294 = arith.divf %292, %293 : vector<1x128xf32>
    %295 = vector.extract_strided_slice %294 {offsets = [0, 0], sizes = [1, 32], strides = [1, 1]} : vector<1x128xf32> to vector<1x32xf32>
    %296 = vector.extract_strided_slice %294 {offsets = [0, 32], sizes = [1, 32], strides = [1, 1]} : vector<1x128xf32> to vector<1x32xf32>
    %297 = vector.extract_strided_slice %294 {offsets = [0, 96], sizes = [1, 32], strides = [1, 1]} : vector<1x128xf32> to vector<1x32xf32>
    %298 = vector.extract_strided_slice %289 {offsets = [0, 64], sizes = [1, 32], strides = [1, 1]} : vector<1x128xf32> to vector<1x32xf32>
    %299 = math.tanh %298 : vector<1x32xf32>
    %300 = arith.mulf %296, %276 : vector<1x32xf32>
    %301 = arith.mulf %295, %299 : vector<1x32xf32>
    %302 = arith.addf %300, %301 : vector<1x32xf32>
    %303 = math.tanh %302 : vector<1x32xf32>
    %304 = arith.mulf %297, %303 : vector<1x32xf32>
    %c2_i32_48 = arith.constant 2 : i32
    %305 = vector.broadcast %c2_i32_48 : i32 to vector<8x1xi32>
    %306 = arith.cmpi eq, %0, %305 : vector<8x1xi32>
    %307 = vector.shape_cast %306 : vector<8x1xi1> to vector<8x1xi1>
    %308 = vector.broadcast %307 : vector<8x1xi1> to vector<8x32xi1>
    %309 = vector.shape_cast %304 : vector<1x32xf32> to vector<1x32xf32>
    %310 = vector.broadcast %309 : vector<1x32xf32> to vector<8x32xf32>
    %311 = arith.select %308, %310, %285 : vector<8x32xi1>, vector<8x32xf32>
    %312 = vector.extract_strided_slice %228 {offsets = [3, 0], sizes = [1, 128], strides = [1, 1]} : vector<8x128xf32> to vector<1x128xf32>
    %313 = arith.truncf %304 : vector<1x32xf32> to vector<1x32xbf16>
    %cst_49 = arith.constant dense<0.000000e+00> : vector<1x128xf32>
    %314 = tpu.matmul %313, %230, %cst_49 {dimension_numbers = #tpu.dot_dimension_numbers<[1], [0], [0], [1], [0, 0, 1, 1], [], []>} : vector<1x32xbf16>, vector<32x128xbf16>, vector<1x128xf32> -> vector<1x128xf32>
    %315 = arith.addf %312, %314 : vector<1x128xf32>
    %316 = arith.negf %315 : vector<1x128xf32>
    %317 = math.exp %316 : vector<1x128xf32>
    %cst_50 = arith.constant 1.000000e+00 : f32
    %318 = vector.broadcast %cst_50 : f32 to vector<1x128xf32>
    %319 = arith.addf %318, %317 : vector<1x128xf32>
    %320 = arith.divf %318, %319 : vector<1x128xf32>
    %321 = vector.extract_strided_slice %320 {offsets = [0, 0], sizes = [1, 32], strides = [1, 1]} : vector<1x128xf32> to vector<1x32xf32>
    %322 = vector.extract_strided_slice %320 {offsets = [0, 32], sizes = [1, 32], strides = [1, 1]} : vector<1x128xf32> to vector<1x32xf32>
    %323 = vector.extract_strided_slice %320 {offsets = [0, 96], sizes = [1, 32], strides = [1, 1]} : vector<1x128xf32> to vector<1x32xf32>
    %324 = vector.extract_strided_slice %315 {offsets = [0, 64], sizes = [1, 32], strides = [1, 1]} : vector<1x128xf32> to vector<1x32xf32>
    %325 = math.tanh %324 : vector<1x32xf32>
    %326 = arith.mulf %322, %302 : vector<1x32xf32>
    %327 = arith.mulf %321, %325 : vector<1x32xf32>
    %328 = arith.addf %326, %327 : vector<1x32xf32>
    %329 = math.tanh %328 : vector<1x32xf32>
    %330 = arith.mulf %323, %329 : vector<1x32xf32>
    %c3_i32_51 = arith.constant 3 : i32
    %331 = vector.broadcast %c3_i32_51 : i32 to vector<8x1xi32>
    %332 = arith.cmpi eq, %0, %331 : vector<8x1xi32>
    %333 = vector.shape_cast %332 : vector<8x1xi1> to vector<8x1xi1>
    %334 = vector.broadcast %333 : vector<8x1xi1> to vector<8x32xi1>
    %335 = vector.shape_cast %330 : vector<1x32xf32> to vector<1x32xf32>
    %336 = vector.broadcast %335 : vector<1x32xf32> to vector<8x32xf32>
    %337 = arith.select %334, %336, %311 : vector<8x32xi1>, vector<8x32xf32>
    %338 = vector.extract_strided_slice %228 {offsets = [4, 0], sizes = [1, 128], strides = [1, 1]} : vector<8x128xf32> to vector<1x128xf32>
    %339 = arith.truncf %330 : vector<1x32xf32> to vector<1x32xbf16>
    %cst_52 = arith.constant dense<0.000000e+00> : vector<1x128xf32>
    %340 = tpu.matmul %339, %230, %cst_52 {dimension_numbers = #tpu.dot_dimension_numbers<[1], [0], [0], [1], [0, 0, 1, 1], [], []>} : vector<1x32xbf16>, vector<32x128xbf16>, vector<1x128xf32> -> vector<1x128xf32>
    %341 = arith.addf %338, %340 : vector<1x128xf32>
    %342 = arith.negf %341 : vector<1x128xf32>
    %343 = math.exp %342 : vector<1x128xf32>
    %cst_53 = arith.constant 1.000000e+00 : f32
    %344 = vector.broadcast %cst_53 : f32 to vector<1x128xf32>
    %345 = arith.addf %344, %343 : vector<1x128xf32>
    %346 = arith.divf %344, %345 : vector<1x128xf32>
    %347 = vector.extract_strided_slice %346 {offsets = [0, 0], sizes = [1, 32], strides = [1, 1]} : vector<1x128xf32> to vector<1x32xf32>
    %348 = vector.extract_strided_slice %346 {offsets = [0, 32], sizes = [1, 32], strides = [1, 1]} : vector<1x128xf32> to vector<1x32xf32>
    %349 = vector.extract_strided_slice %346 {offsets = [0, 96], sizes = [1, 32], strides = [1, 1]} : vector<1x128xf32> to vector<1x32xf32>
    %350 = vector.extract_strided_slice %341 {offsets = [0, 64], sizes = [1, 32], strides = [1, 1]} : vector<1x128xf32> to vector<1x32xf32>
    %351 = math.tanh %350 : vector<1x32xf32>
    %352 = arith.mulf %348, %328 : vector<1x32xf32>
    %353 = arith.mulf %347, %351 : vector<1x32xf32>
    %354 = arith.addf %352, %353 : vector<1x32xf32>
    %355 = math.tanh %354 : vector<1x32xf32>
    %356 = arith.mulf %349, %355 : vector<1x32xf32>
    %c4_i32_54 = arith.constant 4 : i32
    %357 = vector.broadcast %c4_i32_54 : i32 to vector<8x1xi32>
    %358 = arith.cmpi eq, %0, %357 : vector<8x1xi32>
    %359 = vector.shape_cast %358 : vector<8x1xi1> to vector<8x1xi1>
    %360 = vector.broadcast %359 : vector<8x1xi1> to vector<8x32xi1>
    %361 = vector.shape_cast %356 : vector<1x32xf32> to vector<1x32xf32>
    %362 = vector.broadcast %361 : vector<1x32xf32> to vector<8x32xf32>
    %363 = arith.select %360, %362, %337 : vector<8x32xi1>, vector<8x32xf32>
    %364 = vector.extract_strided_slice %228 {offsets = [5, 0], sizes = [1, 128], strides = [1, 1]} : vector<8x128xf32> to vector<1x128xf32>
    %365 = arith.truncf %356 : vector<1x32xf32> to vector<1x32xbf16>
    %cst_55 = arith.constant dense<0.000000e+00> : vector<1x128xf32>
    %366 = tpu.matmul %365, %230, %cst_55 {dimension_numbers = #tpu.dot_dimension_numbers<[1], [0], [0], [1], [0, 0, 1, 1], [], []>} : vector<1x32xbf16>, vector<32x128xbf16>, vector<1x128xf32> -> vector<1x128xf32>
    %367 = arith.addf %364, %366 : vector<1x128xf32>
    %368 = arith.negf %367 : vector<1x128xf32>
    %369 = math.exp %368 : vector<1x128xf32>
    %cst_56 = arith.constant 1.000000e+00 : f32
    %370 = vector.broadcast %cst_56 : f32 to vector<1x128xf32>
    %371 = arith.addf %370, %369 : vector<1x128xf32>
    %372 = arith.divf %370, %371 : vector<1x128xf32>
    %373 = vector.extract_strided_slice %372 {offsets = [0, 0], sizes = [1, 32], strides = [1, 1]} : vector<1x128xf32> to vector<1x32xf32>
    %374 = vector.extract_strided_slice %372 {offsets = [0, 32], sizes = [1, 32], strides = [1, 1]} : vector<1x128xf32> to vector<1x32xf32>
    %375 = vector.extract_strided_slice %372 {offsets = [0, 96], sizes = [1, 32], strides = [1, 1]} : vector<1x128xf32> to vector<1x32xf32>
    %376 = vector.extract_strided_slice %367 {offsets = [0, 64], sizes = [1, 32], strides = [1, 1]} : vector<1x128xf32> to vector<1x32xf32>
    %377 = math.tanh %376 : vector<1x32xf32>
    %378 = arith.mulf %374, %354 : vector<1x32xf32>
    %379 = arith.mulf %373, %377 : vector<1x32xf32>
    %380 = arith.addf %378, %379 : vector<1x32xf32>
    %381 = math.tanh %380 : vector<1x32xf32>
    %382 = arith.mulf %375, %381 : vector<1x32xf32>
    %c5_i32_57 = arith.constant 5 : i32
    %383 = vector.broadcast %c5_i32_57 : i32 to vector<8x1xi32>
    %384 = arith.cmpi eq, %0, %383 : vector<8x1xi32>
    %385 = vector.shape_cast %384 : vector<8x1xi1> to vector<8x1xi1>
    %386 = vector.broadcast %385 : vector<8x1xi1> to vector<8x32xi1>
    %387 = vector.shape_cast %382 : vector<1x32xf32> to vector<1x32xf32>
    %388 = vector.broadcast %387 : vector<1x32xf32> to vector<8x32xf32>
    %389 = arith.select %386, %388, %363 : vector<8x32xi1>, vector<8x32xf32>
    %390 = vector.extract_strided_slice %228 {offsets = [6, 0], sizes = [1, 128], strides = [1, 1]} : vector<8x128xf32> to vector<1x128xf32>
    %391 = arith.truncf %382 : vector<1x32xf32> to vector<1x32xbf16>
    %cst_58 = arith.constant dense<0.000000e+00> : vector<1x128xf32>
    %392 = tpu.matmul %391, %230, %cst_58 {dimension_numbers = #tpu.dot_dimension_numbers<[1], [0], [0], [1], [0, 0, 1, 1], [], []>} : vector<1x32xbf16>, vector<32x128xbf16>, vector<1x128xf32> -> vector<1x128xf32>
    %393 = arith.addf %390, %392 : vector<1x128xf32>
    %394 = arith.negf %393 : vector<1x128xf32>
    %395 = math.exp %394 : vector<1x128xf32>
    %cst_59 = arith.constant 1.000000e+00 : f32
    %396 = vector.broadcast %cst_59 : f32 to vector<1x128xf32>
    %397 = arith.addf %396, %395 : vector<1x128xf32>
    %398 = arith.divf %396, %397 : vector<1x128xf32>
    %399 = vector.extract_strided_slice %398 {offsets = [0, 0], sizes = [1, 32], strides = [1, 1]} : vector<1x128xf32> to vector<1x32xf32>
    %400 = vector.extract_strided_slice %398 {offsets = [0, 32], sizes = [1, 32], strides = [1, 1]} : vector<1x128xf32> to vector<1x32xf32>
    %401 = vector.extract_strided_slice %398 {offsets = [0, 96], sizes = [1, 32], strides = [1, 1]} : vector<1x128xf32> to vector<1x32xf32>
    %402 = vector.extract_strided_slice %393 {offsets = [0, 64], sizes = [1, 32], strides = [1, 1]} : vector<1x128xf32> to vector<1x32xf32>
    %403 = math.tanh %402 : vector<1x32xf32>
    %404 = arith.mulf %400, %380 : vector<1x32xf32>
    %405 = arith.mulf %399, %403 : vector<1x32xf32>
    %406 = arith.addf %404, %405 : vector<1x32xf32>
    %407 = math.tanh %406 : vector<1x32xf32>
    %408 = arith.mulf %401, %407 : vector<1x32xf32>
    %c6_i32_60 = arith.constant 6 : i32
    %409 = vector.broadcast %c6_i32_60 : i32 to vector<8x1xi32>
    %410 = arith.cmpi eq, %0, %409 : vector<8x1xi32>
    %411 = vector.shape_cast %410 : vector<8x1xi1> to vector<8x1xi1>
    %412 = vector.broadcast %411 : vector<8x1xi1> to vector<8x32xi1>
    %413 = vector.shape_cast %408 : vector<1x32xf32> to vector<1x32xf32>
    %414 = vector.broadcast %413 : vector<1x32xf32> to vector<8x32xf32>
    %415 = arith.select %412, %414, %389 : vector<8x32xi1>, vector<8x32xf32>
    %416 = vector.extract_strided_slice %228 {offsets = [7, 0], sizes = [1, 128], strides = [1, 1]} : vector<8x128xf32> to vector<1x128xf32>
    %417 = arith.truncf %408 : vector<1x32xf32> to vector<1x32xbf16>
    %cst_61 = arith.constant dense<0.000000e+00> : vector<1x128xf32>
    %418 = tpu.matmul %417, %230, %cst_61 {dimension_numbers = #tpu.dot_dimension_numbers<[1], [0], [0], [1], [0, 0, 1, 1], [], []>} : vector<1x32xbf16>, vector<32x128xbf16>, vector<1x128xf32> -> vector<1x128xf32>
    %419 = arith.addf %416, %418 : vector<1x128xf32>
    %420 = arith.negf %419 : vector<1x128xf32>
    %421 = math.exp %420 : vector<1x128xf32>
    %cst_62 = arith.constant 1.000000e+00 : f32
    %422 = vector.broadcast %cst_62 : f32 to vector<1x128xf32>
    %423 = arith.addf %422, %421 : vector<1x128xf32>
    %424 = arith.divf %422, %423 : vector<1x128xf32>
    %425 = vector.extract_strided_slice %424 {offsets = [0, 0], sizes = [1, 32], strides = [1, 1]} : vector<1x128xf32> to vector<1x32xf32>
    %426 = vector.extract_strided_slice %424 {offsets = [0, 32], sizes = [1, 32], strides = [1, 1]} : vector<1x128xf32> to vector<1x32xf32>
    %427 = vector.extract_strided_slice %424 {offsets = [0, 96], sizes = [1, 32], strides = [1, 1]} : vector<1x128xf32> to vector<1x32xf32>
    %428 = vector.extract_strided_slice %419 {offsets = [0, 64], sizes = [1, 32], strides = [1, 1]} : vector<1x128xf32> to vector<1x32xf32>
    %429 = math.tanh %428 : vector<1x32xf32>
    %430 = arith.mulf %426, %406 : vector<1x32xf32>
    %431 = arith.mulf %425, %429 : vector<1x32xf32>
    %432 = arith.addf %430, %431 : vector<1x32xf32>
    %433 = math.tanh %432 : vector<1x32xf32>
    %434 = arith.mulf %427, %433 : vector<1x32xf32>
    %c7_i32_63 = arith.constant 7 : i32
    %435 = vector.broadcast %c7_i32_63 : i32 to vector<8x1xi32>
    %436 = arith.cmpi eq, %0, %435 : vector<8x1xi32>
    %437 = vector.shape_cast %436 : vector<8x1xi1> to vector<8x1xi1>
    %438 = vector.broadcast %437 : vector<8x1xi1> to vector<8x32xi1>
    %439 = vector.shape_cast %434 : vector<1x32xf32> to vector<1x32xf32>
    %440 = vector.broadcast %439 : vector<1x32xf32> to vector<8x32xf32>
    %441 = arith.select %438, %440, %415 : vector<8x32xi1>, vector<8x32xf32>
    %442 = arith.truncf %441 : vector<8x32xf32> to vector<8x32xbf16>
    %c0_64 = arith.constant 0 : index
    %c0_65 = arith.constant 0 : index
    %443 = vector.load %arg6[%c0_64, %c0_65] : memref<32x128xbf16, #tpu.memory_space<vmem>>, vector<32x128xbf16>
    %cst_66 = arith.constant dense<0.000000e+00> : vector<8x128xf32>
    %444 = tpu.matmul %442, %443, %cst_66 {dimension_numbers = #tpu.dot_dimension_numbers<[1], [0], [0], [1], [0, 0, 1, 1], [], []>} : vector<8x32xbf16>, vector<32x128xbf16>, vector<8x128xf32> -> vector<8x128xf32>
    %c0_67 = arith.constant 0 : index
    %c0_68 = arith.constant 0 : index
    %445 = vector.load %arg7[%c0_67, %c0_68] : memref<1x128xf32, #tpu.memory_space<vmem>>, vector<1x128xf32>
    %446 = vector.broadcast %445 : vector<1x128xf32> to vector<8x128xf32>
    %447 = arith.addf %444, %446 : vector<8x128xf32>
    %c0_69 = arith.constant 0 : index
    %c0_70 = arith.constant 0 : index
    %448 = vector.load %arg8[%c0_69, %c0_70] : memref<8x128xf32, #tpu.memory_space<vmem>>, vector<8x128xf32>
    tpu.vector_store %arg8[%c0_69, %c0_70], %447 {strides = array<i32>} : memref<8x128xf32, #tpu.memory_space<vmem>>, vector<8x128xf32>,
    return
  }
  func.func @transform_0(%arg0: i32) -> (i32, i32) {
    %c0_i32 = arith.constant 0 : i32
    %c0_i32_0 = arith.constant 0 : i32
    %c0_i32_1 = arith.constant 0 : i32
    return %c0_i32, %c0_i32_0 : i32, i32
  }
  func.func @transform_1(%arg0: i32) -> (i32, i32) {
    %c0_i32 = arith.constant 0 : i32
    %c0_i32_0 = arith.constant 0 : i32
    %c0_i32_1 = arith.constant 0 : i32
    return %c0_i32, %c0_i32_0 : i32, i32
  }
  func.func @transform_2(%arg0: i32) -> (i32, i32, i32) {
    %c0_i32 = arith.constant 0 : i32
    %c0_i32_0 = arith.constant 0 : i32
    %c0_i32_1 = arith.constant 0 : i32
    %c0_i32_2 = arith.constant 0 : i32
    return %c0_i32, %c0_i32_0, %c0_i32_1 : i32, i32, i32
  }
  func.func @transform_3(%arg0: i32) -> (i32, i32, i32) {
    %c0_i32 = arith.constant 0 : i32
    %c0_i32_0 = arith.constant 0 : i32
    %c0_i32_1 = arith.constant 0 : i32
    %c0_i32_2 = arith.constant 0 : i32
    return %c0_i32, %c0_i32_0, %c0_i32_1 : i32, i32, i32
  }
  func.func @transform_4(%arg0: i32) -> (i32, i32, i32) {
    %c0_i32 = arith.constant 0 : i32
    %c0_i32_0 = arith.constant 0 : i32
    %c0_i32_1 = arith.constant 0 : i32
    %c0_i32_2 = arith.constant 0 : i32
    return %c0_i32, %c0_i32_0, %c0_i32_1 : i32, i32, i32
  }
  func.func @transform_5(%arg0: i32) -> (i32, i32) {
    %c0_i32 = arith.constant 0 : i32
    %c0_i32_0 = arith.constant 0 : i32
    %c0_i32_1 = arith.constant 0 : i32
    return %c0_i32, %c0_i32_0 : i32, i32
  }
  func.func @transform_6(%arg0: i32) -> (i32, i32) {
    %c0_i32 = arith.constant 0 : i32
    %c0_i32_0 = arith.constant 0 : i32
    %c0_i32_1 = arith.constant 0 : i32
    return %c0_i32, %c0_i32_0 : i32, i32
  }
  func.func @transform_7(%arg0: i32) -> (i32, i32) {
    %c0_i32 = arith.constant 0 : i32
    %c0_i32_0 = arith.constant 0 : i32
    %c0_i32_1 = arith.constant 0 : i32
    return %c0_i32, %c0_i32_0 : i32, i32
  }
}

</mosaic_0001>

<bundles_post_ra>
// kernel: tpu_custom_call.1
= control target key start
LH: loop header
LB: loop body
LE: loop exit
PB: predicated region body
PF: predicated region fallthrough
CT: control target
= control target key end

     0   :  { %12 = vsyncpa [#allocation3], 0  ;;  %s2619_s0 = inlined_call_operand.hbm [shape: bf16[8,16], index: 0, kind: input, shape index: {}]   ;;  %s2620_s1 = inlined_call_operand.hbm [shape: bf16[16,128], index: 1, kind: input, shape index: {}]   ;;  %s2621_s2 = inlined_call_operand.hbm [shape: bf16[1,32,128], index: 2, kind: input, shape index: {}]   ;;  %s2622_s3 = inlined_call_operand.hbm [shape: bf16[2,32,128], index: 3, kind: input, shape index: {}]   ;;  %s2623_s4 = inlined_call_operand.vmem [shape: f32[2,1,128], index: 4, kind: input, shape index: {}]   ;;  %s2624_s5 = inlined_call_operand.hbm [shape: bf16[32,128], index: 5, kind: input, shape index: {}]   ;;  %s2625_s6 = inlined_call_operand.vmem [shape: f32[1,128], index: 6, kind: input, shape index: {}]   ;;  %s2626_s7 = inlined_call_operand.hbm [shape: f32[8,128], index: 7, kind: output, shape index: {}]  }
   0x1   :  { %13 = vsyncpa [#allocation6], 0 }
   0x2   :  { %14 = vsyncpa [#allocation9], 0 }
   0x3   :  { %15 = vsyncpa [#allocation4], 0  ;;  %s2229_s24 = smov [#allocation5]  }
   0x4   :  { %s31_s25 = sshll.u32 %s2229_s24, 4  ;;  %s32_s25 = int_to_ptr.vmem [resolvable:$true] %s31_s25 }
   0x5   :  { %s2109_s26 = scalar_lea.vmem %s32_s25, 128  ;;  %p2114_p1 = scmp.lt.s32.totalorder %s32_s25, %s32_s25 }
   0x6   :  { %p2110_p0 = scmp.ne.s32.totalorder %s32_s25, %s2109_s26  ;;  %p2115_p2 = scmp.lt.s32.totalorder %s2109_s26, %s2109_s26 }
   0x8   :  { %p2116_p3 = por %p2115_p2, %p2114_p1 }
   0xa   :  { %p2117_p4 = pnand %p2116_p3, %p2110_p0 }
   0xc   :  { %2120 = shalt.err (!%p2117_p4)
}
   0xd   :  { %s2230_s27 = smov 64   ;;  %s2231_s28 = smov 4  }
   0xe   :  { %37 = dma.hbm_to_vmem [thread:$0]  %s2620_s1, 128, %s32_s25, [#allocation6], %s2230_s27, %s2230_s27, %s2231_s28  }
   0xf   :  { %s2232_s8 = smov [#allocation8]   ;;  %s2233_s10 = smov [#allocation2]  }
  0x10   :  { %s55_s9 = sshll.u32 %s2232_s8, 4  ;;  %s22_s11 = sshll.u32 %s2233_s10, 4  ;;  %s56_s9 = int_to_ptr.vmem [resolvable:$true] %s55_s9  ;;  %s23_s11 = int_to_ptr.vmem [resolvable:$true] %s22_s11 }
  0x11   :  { %s2129_s12 = scalar_lea.vmem %s56_s9, 512  ;;  %p2134_p6 = scmp.lt.s32.totalorder %s56_s9, %s56_s9 }
  0x12   :  { %p2130_p5 = scmp.ne.s32.totalorder %s56_s9, %s2129_s12  ;;  %p2135_p7 = scmp.lt.s32.totalorder %s2129_s12, %s2129_s12 }
  0x14   :  { %p2136_p8 = por %p2135_p7, %p2134_p6 }
  0x16   :  { %p2137_p9 = pnand %p2136_p8, %p2130_p5 }
  0x18   :  { %2140 = shalt.err (!%p2137_p9)
}
  0x19   :  { %61 = dma.hbm_to_vmem [thread:$0]  %s2622_s3, 512, %s56_s9, [#allocation9], %s2230_s27, %s2230_s27, %s2231_s28  }
  0x1a   :  { %s2149_s1 = scalar_lea.vmem %s23_s11, 64  ;;  %p2154_p11 = scmp.lt.s32.totalorder %s23_s11, %s23_s11 }
  0x1b   :  { %p2150_p10 = scmp.ne.s32.totalorder %s23_s11, %s2149_s1  ;;  %p2155_p12 = scmp.lt.s32.totalorder %s2149_s1, %s2149_s1 }
  0x1d   :  { %p2156_p13 = por %p2155_p12, %p2154_p11 }
  0x1f   :  { %p2157_p0 = pnand %p2156_p13, %p2150_p10 }
  0x21   :  { %2160 = shalt.err (!%p2157_p0)
}
  0x22   :  { %25 = dma.hbm_to_vmem [thread:$0]  %s2619_s0, 64, %s23_s11, [#allocation3]  }
  0x23   :  { %s2234_s17 = smov [#allocation7]   ;;  %s2235_s19 = smov [#allocation10]  }
  0x24   :  { %s43_s18 = sshll.u32 %s2234_s17, 4  ;;  %s69_s20 = sshll.u32 %s2235_s19, 4  ;;  %s44_s18 = int_to_ptr.vmem [resolvable:$true] %s43_s18  ;;  %s70_s20 = int_to_ptr.vmem [resolvable:$true] %s69_s20 }
  0x25   :  { %s2169_s21 = scalar_lea.vmem %s44_s18, 256  ;;  %p2174_p2 = scmp.lt.s32.totalorder %s44_s18, %s44_s18 }
  0x26   :  { %p2170_p1 = scmp.ne.s32.totalorder %s44_s18, %s2169_s21  ;;  %p2175_p3 = scmp.lt.s32.totalorder %s2169_s21, %s2169_s21 }
  0x28   :  { %p2176_p4 = por %p2175_p3, %p2174_p2 }
  0x2a   :  { %p2177_p5 = pnand %p2176_p4, %p2170_p1 }
  0x2c   :  { %2180 = shalt.err (!%p2177_p5)
}
  0x2d   :  { %49 = dma.hbm_to_vmem [thread:$0]  %s2621_s2, 256, %s44_s18, [#allocation6], %s2230_s27, %s2230_s27, %s2231_s28  }
  0x2e   :  { %s2189_s0 = scalar_lea.vmem %s70_s20, 256  ;;  %p2194_p7 = scmp.lt.s32.totalorder %s70_s20, %s70_s20 }
  0x2f   :  { %p2190_p6 = scmp.ne.s32.totalorder %s70_s20, %s2189_s0  ;;  %p2195_p8 = scmp.lt.s32.totalorder %s2189_s0, %s2189_s0 }
  0x31   :  { %p2196_p9 = por %p2195_p8, %p2194_p7 }
  0x33   :  { %p2197_p10 = pnand %p2196_p9, %p2190_p6 }
  0x35   :  { %2200 = shalt.err (!%p2197_p10)
}
  0x36   :  { %75 = dma.hbm_to_vmem [thread:$0]  %s2624_s5, 256, %s70_s20, [#allocation9], %s2230_s27, %s2230_s27, %s2231_s28  }
  0x37   :  { %2221 = dma.done.wait [#allocation3], 64  }
  0x38   :  { %2222 = vsyncadd [#allocation3], 4294967232 }
  0x39   :  { %2223 = dma.done.wait [#allocation6], 384  }
  0x3a   :  { %2224 = vsyncadd [#allocation6], 4294966912 }
  0x3b   :  { %2225 = dma.done.wait [#allocation9], 768  }
  0x3c   :  { %2226 = vsyncadd [#allocation9], 4294966528  ;;  %v2236_v0 = vmov 0.0   ;;  %vm2237_vm0 = vmmov 0   ;;  %v1964_v1 = vld [vmem:[#allocation5] sm:$0xff]   ;;  %vm112_vm1 = vcmask 130048   ;;  %v94_v50 = vlaneseq }
  0x3d   :  { %1802 = vmatprep.subr.bf16.mxu0 %v2236_v0  ;;  %1808 = vmatprep.subr.bf16.mxu1 %v2236_v0  ;;  %v2314_v2 = vld [vmem:[#allocation8 + $0x8] sm:$0xff]   ;;  %v96_v3 = vld [vmem:[#allocation2] sm:$0xf]  ;;  %v2238_v5 = vmov 0   ;;  %s2239_s25 = smov 32   ;;  %vm172_vm2 = vcmask 261120  }
  0x3e   :  { %1804 = vmatprep.mubr.msk.bf16.mxu0 %vm2237_vm0, %v2236_v0  ;;  %1812 = vmatprep.mubr.msk.bf16.mxu1 %vm2237_vm0, %v2236_v0  ;;  %v2317_v4 = vld [vmem:[#allocation8] sm:$0xff]   ;;  %v2357_v51 = vshrl.u32 %v94_v50, 7 }
  0x3f   :  { %1803 = vmatpush3.bf16.msra.mxu0 %v1964_v1  ;;  %1809 = vmatpush3.bf16.msra.mxu1 %v2314_v2  ;;  %v1700_v6 = vld [vmem:[%s2623_s4] ss:$0 sm:$0xff] }
  0x40   :  { %1816 = vmatprep.subr.bf16.mxu0 %v2236_v0  ;;  %1810 = vmatprep.subr.bf16.mxu1 %v2236_v0  ;;  %v246_v52 = vsub.s32 0, %v2357_v51  ;;  %v332_v53 = vsub.s32 1, %v2357_v51  ;;  %vm241_vm3 = vcmp.eq.s32.totalorder %v2357_v51, 0  ;;  %vm327_vm4 = vcmp.eq.s32.totalorder %v2357_v51, 1 }
  0x41   :  { %vm415_vm5 = vcmp.eq.s32.totalorder %v2357_v51, 2  ;;  %vm502_vm6 = vcmp.eq.s32.totalorder %v2357_v51, 3  ;;  %vm591_vm7 = vcmp.eq.s32.totalorder %v2357_v51, 4  ;;  %vm678_vm8 = vcmp.eq.s32.totalorder %v2357_v51, 5 }
  0x42   :  { %1805 = vmatmul.mubr.msk.bf16.vlgmr.msra.gmra.mxu0 %vm112_vm1, %v96_v3  ;;  %vm767_vm9 = vcmp.eq.s32.totalorder %v2357_v51, 6  ;;  %vm854_vm10 = vcmp.eq.s32.totalorder %v2357_v51, 7 }
  0x43   :  { %1817 = vmatpush3.bf16.msra.mxu0 %v2314_v2  ;;  %1820 = vmatprep.mubr.msk.bf16.mxu0 %vm2237_vm0, %v2236_v0 }
  0x44   :  { %1811 = vmatpush3.bf16.msra.mxu1 %v2317_v4  ;;  %1818 = vmatprep.subr.bf16.mxu0 %v2236_v0 }
  0x45   :  { %1824 = vmatprep.subr.bf16.mxu1 %v2236_v0 }
  0x47   :  { %1813 = vmatmul.mubr.bf16.vlgmr.msra.gmra.mxu1 %v2238_v5  ;;  %1819 = vmatpush3.bf16.msra.mxu0 %v2317_v4 }
  0x48   :  { %1825 = vmatpush3.bf16.msra.mxu1 %v2314_v2  ;;  %1828 = vmatprep.mubr.msk.bf16.mxu1 %vm2237_vm0, %v2236_v0 }
  0x49   :  { %1826 = vmatprep.subr.bf16.mxu1 %v2236_v0  ;;  %1832 = vmatprep.subr.bf16.mxu0 %v2236_v0 }
  0x4c   :  { %1827 = vmatpush3.bf16.msra.mxu1 %v2317_v4 }
  0x4d   :  { %1840 = vmatprep.subr.bf16.mxu1 %v2236_v0 }
 0x102   :  { %v150_v7 = vpop.f32.mrf.mxu0 }
 0x103   :  { %v2339_v8 = vadd.f32 %v1700_v6, %v150_v7 }
 0x104   :  { %v1806_v9 = vpop.f32.mrf.mxu0 }
 0x106   :  { %v153_v10 = vpop.f32.mrf.mxu0 }
 0x107   :  { %v210_v11 = vpop.f32.mrf.mxu1 }
 0x108   :  { %v216_v12 = vadd.f32 %v210_v11, %v2339_v8  ;;  %v1807_v13 = vpop.f32.mrf.mxu0 }
 0x109   :  { %v1814_v14 = vpop.f32.mrf.mxu1 }
 0x10a   :  { %1973 = vtanh.f32 %v216_v12  ;;  %v1705_v18 = vmul.f32 -1.442695, %v216_v12 }
 0x10b   :  { %v213_v15 = vpop.f32.mrf.mxu1 }
 0x10c   :  { %1975 = vpow2.f32 %v1705_v18 }
 0x10d   :  { %v1815_v16 = vpop.f32.mrf.mxu1 }
 0x117   :  { %v1974_v17 = vpop.eup %1973 }
 0x118   :  { %226 = vrot.lane.b32.xlu0 %v1974_v17, %s2230_s27 }
 0x119   :  { %v1976_v19 = vpop.eup %1975 }
 0x11a   :  { %v220_v20 = vadd.f32 1.0, %v1976_v19 }
 0x11c   :  { %1977 = vrcp.f32 %v220_v20 }
 0x129   :  { %v1978_v21 = vpop.eup %1977 }
 0x12a   :  { %v224_v24 = vmul.f32 0.0, %v1978_v21 }
 0x18a   :  { %v227_v22 = vpop.permute.xlu0 %226 }
 0x18b   :  { %v229_v23 = vmul.f32 %v1978_v21, %v227_v22  ;;  %v420_v22 = vsub.s32 2, %v2357_v51 }
 0x18d   :  { %231 = vrot.lane.b32.xlu0 %v229_v23, %s2239_s25 }
 0x1ff   :  { %v232_v25 = vpop.permute.xlu0 %231 }
 0x200   :  { %v234_v26 = vadd.f32 %v232_v25, %v224_v24 }
 0x202   :  { %1979 = vtanh.f32 %v234_v26  ;;  %v308_v45 = vrot.slane %v234_v26, 7 }
 0x20f   :  { %v1980_v27 = vpop.eup %1979 }
 0x210   :  { %237 = vrot.lane.b32.xlu1 %v1980_v27, %s2230_s27 }
 0x282   :  { %v238_v28 = vpop.permute.xlu1 %237 }
 0x283   :  { %v240_v29 = vmul.f32 %v1978_v21, %v238_v28 }
 0x285   :  { %v249_v30 = vpack.c.bf16 %v240_v29, %v240_v29  ;;  %v247_v54 = vrot.slane %v240_v29, %v246_v52 }
 0x287   :  { %251 = vrot.lane.b32.xlu1 %v249_v30, %s2239_s25  ;;  %v248_v59 = vsel %vm241_vm3, %v247_v54, 0.0 }
 0x2f9   :  { %v252_v31 = vpop.permute.xlu1 %251 }
 0x2fa   :  { %1821 = vmatmul.mubr.msk.bf16.vlgmr.msra.gmra.mxu0 %vm172_vm2, %v252_v31 }
 0x2fb   :  { %1833 = vmatpush3.bf16.msra.mxu0 %v2314_v2  ;;  %1836 = vmatprep.mubr.msk.bf16.mxu0 %vm2237_vm0, %v2236_v0 }
 0x2fc   :  { %1834 = vmatprep.subr.bf16.mxu0 %v2236_v0 }
 0x2ff   :  { %1835 = vmatpush3.bf16.msra.mxu0 %v2317_v4 }
 0x300   :  { %1848 = vmatprep.subr.bf16.mxu0 %v2236_v0 }
 0x3ba   :  { %v290_v32 = vpop.f32.mrf.mxu0 }
 0x3bb   :  { %v297_v33 = vrot.slane %v290_v32, 7 }
 0x3bc   :  { %v1822_v34 = vpop.f32.mrf.mxu0 }
 0x3bd   :  { %v299_v35 = vadd.f32 %v297_v33, %v2339_v8 }
 0x3be   :  { %v293_v36 = vpop.f32.mrf.mxu0 }
 0x3bf   :  { %1981 = vtanh.f32 %v299_v35  ;;  %v1707_v39 = vmul.f32 -1.442695, %v299_v35 }
 0x3c0   :  { %v1823_v37 = vpop.f32.mrf.mxu0 }
 0x3c1   :  { %1983 = vpow2.f32 %v1707_v39 }
 0x3cc   :  { %v1982_v38 = vpop.eup %1981 }
 0x3cd   :  { %312 = vrot.lane.b32.xlu0 %v1982_v38, %s2230_s27 }
 0x3ce   :  { %v1984_v40 = vpop.eup %1983 }
 0x3cf   :  { %v303_v41 = vadd.f32 1.0, %v1984_v40 }
 0x3d1   :  { %1985 = vrcp.f32 %v303_v41 }
 0x3de   :  { %v1986_v42 = vpop.eup %1985 }
 0x3df   :  { %v310_v46 = vmul.f32 %v1986_v42, %v308_v45 }
 0x43f   :  { %v313_v43 = vpop.permute.xlu0 %312 }
 0x440   :  { %v315_v44 = vmul.f32 %v1986_v42, %v313_v43 }
 0x442   :  { %317 = vrot.lane.b32.xlu1 %v315_v44, %s2239_s25 }
 0x4b4   :  { %v318_v47 = vpop.permute.xlu1 %317 }
 0x4b5   :  { %v320_v48 = vadd.f32 %v318_v47, %v310_v46 }
 0x4b7   :  { %1987 = vtanh.f32 %v320_v48  ;;  %v396_v17 = vrot.slane %v320_v48, 7  ;;  %v507_v48 = vsub.s32 3, %v2357_v51 }
 0x4c4   :  { %v1988_v49 = vpop.eup %1987 }
 0x4c5   :  { %323 = vrot.lane.b32.xlu0 %v1988_v49, %s2230_s27 }
 0x537   :  { %v324_v55 = vpop.permute.xlu0 %323 }
 0x538   :  { %v326_v56 = vmul.f32 %v1986_v42, %v324_v55 }
 0x53a   :  { %v333_v57 = vrot.slane %v326_v56, %v332_v53  ;;  %v335_v58 = vpack.c.bf16 %v326_v56, %v326_v56 }
 0x53c   :  { %v334_v60 = vsel %vm327_vm4, %v333_v57, %v248_v59  ;;  %v337_v61 = vshrl.u32 %v335_v58, 16 }
 0x53e   :  { %339 = vrot.lane.b32.xlu1 %v337_v61, %s2239_s25 }
 0x5b0   :  { %v340_v62 = vpop.permute.xlu1 %339 }
 0x5b1   :  { %1829 = vmatmul.mubr.msk.bf16.vlgmr.msra.gmra.mxu1 %vm172_vm2, %v340_v62 }
 0x5b2   :  { %1841 = vmatpush3.bf16.msra.mxu1 %v2314_v2  ;;  %1844 = vmatprep.mubr.msk.bf16.mxu1 %vm2237_vm0, %v2236_v0 }
 0x5b3   :  { %1842 = vmatprep.subr.bf16.mxu1 %v2236_v0 }
 0x5b6   :  { %1843 = vmatpush3.bf16.msra.mxu1 %v2317_v4 }
 0x5b7   :  { %1856 = vmatprep.subr.bf16.mxu1 %v2236_v0 }
 0x671   :  { %v378_v63 = vpop.f32.mrf.mxu1 }
 0x672   :  { %v385_v1 = vrot.slane %v378_v63, 6 }
 0x673   :  { %v1830_v3 = vpop.f32.mrf.mxu1 }
 0x674   :  { %v387_v6 = vadd.f32 %v385_v1, %v2339_v8 }
 0x675   :  { %v381_v7 = vpop.f32.mrf.mxu1 }
 0x676   :  { %1989 = vtanh.f32 %v387_v6  ;;  %v1709_v11 = vmul.f32 -1.442695, %v387_v6 }
 0x677   :  { %v1831_v9 = vpop.f32.mrf.mxu1 }
 0x678   :  { %1991 = vpow2.f32 %v1709_v11 }
 0x683   :  { %v1990_v10 = vpop.eup %1989 }
 0x684   :  { %400 = vrot.lane.b32.xlu0 %v1990_v10, %s2230_s27 }
 0x685   :  { %v1992_v12 = vpop.eup %1991 }
 0x686   :  { %v391_v13 = vadd.f32 1.0, %v1992_v12 }
 0x688   :  { %1993 = vrcp.f32 %v391_v13 }
 0x695   :  { %v1994_v14 = vpop.eup %1993 }
 0x696   :  { %v398_v18 = vmul.f32 %v1994_v14, %v396_v17 }
 0x6f6   :  { %v401_v15 = vpop.permute.xlu0 %400 }
 0x6f7   :  { %v403_v16 = vmul.f32 %v1994_v14, %v401_v15 }
 0x6f9   :  { %405 = vrot.lane.b32.xlu1 %v403_v16, %s2239_s25 }
 0x76b   :  { %v406_v19 = vpop.permute.xlu1 %405 }
 0x76c   :  { %v408_v20 = vadd.f32 %v406_v19, %v398_v18  ;;  %v596_v19 = vsub.s32 4, %v2357_v51 }
 0x76e   :  { %1995 = vtanh.f32 %v408_v20  ;;  %v483_v43 = vrot.slane %v408_v20, 7 }
 0x77b   :  { %v1996_v21 = vpop.eup %1995 }
 0x77c   :  { %411 = vrot.lane.b32.xlu0 %v1996_v21, %s2230_s27 }
 0x7ee   :  { %v412_v23 = vpop.permute.xlu0 %411 }
 0x7ef   :  { %v414_v24 = vmul.f32 %v1994_v14, %v412_v23 }
 0x7f1   :  { %v421_v25 = vrot.slane %v414_v24, %v420_v22  ;;  %v423_v26 = vpack.c.bf16 %v414_v24, %v414_v24 }
 0x7f3   :  { %v422_v27 = vsel %vm415_vm5, %v421_v25, %v334_v60  ;;  %v425_v28 = vrot.slane %v423_v26, 1 }
 0x7f5   :  { %426 = vrot.lane.b32.xlu1 %v425_v28, %s2239_s25 }
 0x867   :  { %v427_v29 = vpop.permute.xlu1 %426 }
 0x868   :  { %1837 = vmatmul.mubr.msk.bf16.vlgmr.msra.gmra.mxu0 %vm172_vm2, %v427_v29 }
 0x869   :  { %1849 = vmatpush3.bf16.msra.mxu0 %v2314_v2  ;;  %1852 = vmatprep.mubr.msk.bf16.mxu0 %vm2237_vm0, %v2236_v0 }
 0x86a   :  { %1850 = vmatprep.subr.bf16.mxu0 %v2236_v0 }
 0x86d   :  { %1851 = vmatpush3.bf16.msra.mxu0 %v2317_v4 }
 0x86e   :  { %1864 = vmatprep.subr.bf16.mxu0 %v2236_v0 }
 0x928   :  { %v465_v30 = vpop.f32.mrf.mxu0 }
 0x929   :  { %v472_v31 = vrot.slane %v465_v30, 5 }
 0x92a   :  { %v1838_v32 = vpop.f32.mrf.mxu0 }
 0x92b   :  { %v474_v33 = vadd.f32 %v472_v31, %v2339_v8 }
 0x92c   :  { %v468_v34 = vpop.f32.mrf.mxu0 }
 0x92d   :  { %1997 = vtanh.f32 %v474_v33  ;;  %v1711_v37 = vmul.f32 -1.442695, %v474_v33 }
 0x92e   :  { %v1839_v35 = vpop.f32.mrf.mxu0 }
 0x92f   :  { %1999 = vpow2.f32 %v1711_v37 }
 0x93a   :  { %v1998_v36 = vpop.eup %1997 }
 0x93b   :  { %487 = vrot.lane.b32.xlu0 %v1998_v36, %s2230_s27 }
 0x93c   :  { %v2000_v38 = vpop.eup %1999 }
 0x93d   :  { %v478_v39 = vadd.f32 1.0, %v2000_v38 }
 0x93f   :  { %2001 = vrcp.f32 %v478_v39 }
 0x94c   :  { %v2002_v40 = vpop.eup %2001 }
 0x94d   :  { %v485_v44 = vmul.f32 %v2002_v40, %v483_v43 }
 0x9ad   :  { %v488_v41 = vpop.permute.xlu0 %487 }
 0x9ae   :  { %v490_v42 = vmul.f32 %v2002_v40, %v488_v41 }
 0x9b0   :  { %492 = vrot.lane.b32.xlu1 %v490_v42, %s2239_s25 }
 0xa22   :  { %v493_v45 = vpop.permute.xlu1 %492 }
 0xa23   :  { %v495_v46 = vadd.f32 %v493_v45, %v485_v44  ;;  %v683_v44 = vsub.s32 5, %v2357_v51 }
 0xa25   :  { %2003 = vtanh.f32 %v495_v46  ;;  %v572_v14 = vrot.slane %v495_v46, 7 }
 0xa32   :  { %v2004_v47 = vpop.eup %2003 }
 0xa33   :  { %498 = vrot.lane.b32.xlu0 %v2004_v47, %s2230_s27 }
 0xaa5   :  { %v499_v49 = vpop.permute.xlu0 %498 }
 0xaa6   :  { %v501_v50 = vmul.f32 %v2002_v40, %v499_v49 }
 0xaa8   :  { %v508_v54 = vrot.slane %v501_v50, %v507_v48  ;;  %v510_v55 = vpack.c.bf16 %v501_v50, %v501_v50 }
 0xaaa   :  { %v509_v56 = vsel %vm502_vm6, %v508_v54, %v422_v27  ;;  %v512_v57 = vshrl.u32 %v510_v55, 16 }
 0xaac   :  { %v514_v58 = vrot.slane %v512_v57, 1 }
 0xaae   :  { %515 = vrot.lane.b32.xlu1 %v514_v58, %s2239_s25 }
 0xb20   :  { %v516_v59 = vpop.permute.xlu1 %515 }
 0xb21   :  { %1845 = vmatmul.mubr.msk.bf16.vlgmr.msra.gmra.mxu1 %vm172_vm2, %v516_v59 }
 0xb22   :  { %1857 = vmatpush3.bf16.msra.mxu1 %v2314_v2  ;;  %1860 = vmatprep.mubr.msk.bf16.mxu1 %vm2237_vm0, %v2236_v0 }
 0xb23   :  { %1858 = vmatprep.subr.bf16.mxu1 %v2236_v0 }
 0xb26   :  { %1859 = vmatpush3.bf16.msra.mxu1 %v2317_v4 }
 0xb27   :  { %1872 = vmatprep.subr.bf16.mxu1 %v2236_v0 }
 0xbe1   :  { %v554_v60 = vpop.f32.mrf.mxu1 }
 0xbe2   :  { %v561_v61 = vrot.slane %v554_v60, 4 }
 0xbe3   :  { %v1846_v62 = vpop.f32.mrf.mxu1 }
 0xbe4   :  { %v563_v63 = vadd.f32 %v561_v61, %v2339_v8 }
 0xbe5   :  { %v557_v1 = vpop.f32.mrf.mxu1 }
 0xbe6   :  { %2005 = vtanh.f32 %v563_v63  ;;  %v1713_v7 = vmul.f32 -1.442695, %v563_v63 }
 0xbe7   :  { %v1847_v3 = vpop.f32.mrf.mxu1 }
 0xbe8   :  { %2007 = vpow2.f32 %v1713_v7 }
 0xbf3   :  { %v2006_v6 = vpop.eup %2005 }
 0xbf4   :  { %576 = vrot.lane.b32.xlu0 %v2006_v6, %s2230_s27 }
 0xbf5   :  { %v2008_v9 = vpop.eup %2007 }
 0xbf6   :  { %v567_v10 = vadd.f32 1.0, %v2008_v9 }
 0xbf8   :  { %2009 = vrcp.f32 %v567_v10 }
 0xc05   :  { %v2010_v11 = vpop.eup %2009 }
 0xc06   :  { %v574_v15 = vmul.f32 %v2010_v11, %v572_v14 }
 0xc66   :  { %v577_v12 = vpop.permute.xlu0 %576 }
 0xc67   :  { %v579_v13 = vmul.f32 %v2010_v11, %v577_v12 }
 0xc69   :  { %581 = vrot.lane.b32.xlu1 %v579_v13, %s2239_s25 }
 0xcdb   :  { %v582_v16 = vpop.permute.xlu1 %581 }
 0xcdc   :  { %v584_v17 = vadd.f32 %v582_v16, %v574_v15  ;;  %v772_v16 = vsub.s32 6, %v2357_v51 }
 0xcde   :  { %2011 = vtanh.f32 %v584_v17  ;;  %v659_v39 = vrot.slane %v584_v17, 7 }
 0xceb   :  { %v2012_v18 = vpop.eup %2011 }
 0xcec   :  { %587 = vrot.lane.b32.xlu0 %v2012_v18, %s2230_s27 }
 0xd5e   :  { %v588_v20 = vpop.permute.xlu0 %587 }
 0xd5f   :  { %v590_v21 = vmul.f32 %v2010_v11, %v588_v20 }
 0xd61   :  { %v597_v23 = vrot.slane %v590_v21, %v596_v19  ;;  %v599_v24 = vpack.c.bf16 %v590_v21, %v590_v21 }
 0xd63   :  { %v598_v25 = vsel %vm591_vm7, %v597_v23, %v509_v56  ;;  %v601_v26 = vrot.slane %v599_v24, 2 }
 0xd65   :  { %602 = vrot.lane.b32.xlu1 %v601_v26, %s2239_s25 }
 0xdd7   :  { %v603_v27 = vpop.permute.xlu1 %602 }
 0xdd8   :  { %1853 = vmatmul.mubr.msk.bf16.vlgmr.msra.gmra.mxu0 %vm172_vm2, %v603_v27 }
 0xdd9   :  { %1865 = vmatpush3.bf16.msra.mxu0 %v2314_v2  ;;  %1868 = vmatprep.mubr.msk.bf16.mxu0 %vm2237_vm0, %v2236_v0 }
 0xdda   :  { %1866 = vmatprep.subr.bf16.mxu0 %v2236_v0 }
 0xddd   :  { %1867 = vmatpush3.bf16.msra.mxu0 %v2317_v4 }
 0xdde   :  { %1880 = vmatprep.subr.bf16.mxu0 %v2236_v0 }
 0xe98   :  { %v641_v28 = vpop.f32.mrf.mxu0 }
 0xe99   :  { %v648_v29 = vrot.slane %v641_v28, 3 }
 0xe9a   :  { %v1854_v30 = vpop.f32.mrf.mxu0 }
 0xe9b   :  { %v650_v31 = vadd.f32 %v648_v29, %v2339_v8 }
 0xe9c   :  { %v644_v32 = vpop.f32.mrf.mxu0 }
 0xe9d   :  { %2013 = vtanh.f32 %v650_v31  ;;  %v1715_v2 = vmul.f32 -1.442695, %v650_v31 }
 0xe9e   :  { %v1855_v33 = vpop.f32.mrf.mxu0 }
 0xe9f   :  { %2015 = vpow2.f32 %v1715_v2 }
 0xeaa   :  { %v2014_v34 = vpop.eup %2013 }
 0xeab   :  { %663 = vrot.lane.b32.xlu0 %v2014_v34, %s2230_s27 }
 0xeac   :  { %v2016_v35 = vpop.eup %2015 }
 0xead   :  { %v654_v36 = vadd.f32 1.0, %v2016_v35 }
 0xeaf   :  { %2017 = vrcp.f32 %v654_v36 }
 0xebc   :  { %v2018_v37 = vpop.eup %2017 }
 0xebd   :  { %v661_v40 = vmul.f32 %v2018_v37, %v659_v39 }
 0xf1d   :  { %v664_v4 = vpop.permute.xlu0 %663 }
 0xf1e   :  { %v666_v38 = vmul.f32 %v2018_v37, %v664_v4 }
 0xf20   :  { %668 = vrot.lane.b32.xlu1 %v666_v38, %s2239_s25 }
 0xf92   :  { %v669_v41 = vpop.permute.xlu1 %668 }
 0xf93   :  { %v671_v42 = vadd.f32 %v669_v41, %v661_v40  ;;  %v2464_v40 = vld [vmem:[#allocation8 + $0x18] sm:$0xff]  }
 0xf94   :  { %v1968_v41 = vld [vmem:[#allocation7 + $0x8] sm:$0xff]  }
 0xf95   :  { %2019 = vtanh.f32 %v671_v42  ;;  %v748_v11 = vrot.slane %v671_v42, 7  ;;  %v2467_v42 = vld [vmem:[#allocation8 + $0x10] sm:$0xff]  }
 0xfa2   :  { %v2020_v43 = vpop.eup %2019 }
 0xfa3   :  { %674 = vrot.lane.b32.xlu0 %v2020_v43, %s2230_s27  ;;  %v1970_v43 = vld [vmem:[#allocation7] sm:$0xff]  }
0x1015   :  { %v675_v45 = vpop.permute.xlu0 %674 }
0x1016   :  { %v677_v46 = vmul.f32 %v2018_v37, %v675_v45 }
0x1018   :  { %v684_v47 = vrot.slane %v677_v46, %v683_v44  ;;  %v686_v49 = vpack.c.bf16 %v677_v46, %v677_v46  ;;  %v859_v46 = vsub.s32 7, %v2357_v51 }
0x101a   :  { %v685_v50 = vsel %vm678_vm8, %v684_v47, %v598_v25  ;;  %v688_v54 = vshrl.u32 %v686_v49, 16 }
0x101c   :  { %v690_v55 = vrot.slane %v688_v54, 2 }
0x101e   :  { %691 = vrot.lane.b32.xlu1 %v690_v55, %s2239_s25 }
0x1090   :  { %v692_v56 = vpop.permute.xlu1 %691 }
0x1091   :  { %1861 = vmatmul.mubr.msk.bf16.vlgmr.msra.gmra.mxu1 %vm172_vm2, %v692_v56 }
0x1092   :  { %1876 = vmatprep.mubr.msk.bf16.mxu1 %vm2237_vm0, %v2236_v0  ;;  %1873 = vmatpush3.bf16.msra.mxu1 %v1968_v41 }
0x1093   :  { %1874 = vmatprep.subr.bf16.mxu1 %v2236_v0 }
0x1096   :  { %1875 = vmatpush3.bf16.msra.mxu1 %v1970_v43 }
0x1097   :  { %1888 = vmatprep.subr.bf16.mxu1 %v2236_v0 }
0x1151   :  { %v730_v57 = vpop.f32.mrf.mxu1 }
0x1152   :  { %v737_v58 = vrot.slane %v730_v57, 2 }
0x1153   :  { %v1862_v59 = vpop.f32.mrf.mxu1 }
0x1154   :  { %v739_v60 = vadd.f32 %v737_v58, %v2339_v8 }
0x1155   :  { %v733_v61 = vpop.f32.mrf.mxu1 }
0x1156   :  { %2021 = vtanh.f32 %v739_v60  ;;  %v1717_v1 = vmul.f32 -1.442695, %v739_v60  ;;  %v1721_v60 = vld [vmem:[%s2623_s4 + $0x1] ss:$0 sm:$0xff] }
0x1157   :  { %v1863_v62 = vpop.f32.mrf.mxu1 }
0x1158   :  { %2023 = vpow2.f32 %v1717_v1 }
0x1163   :  { %v2022_v63 = vpop.eup %2021 }
0x1164   :  { %752 = vrot.lane.b32.xlu0 %v2022_v63, %s2230_s27 }
0x1165   :  { %v2024_v3 = vpop.eup %2023 }
0x1166   :  { %v743_v6 = vadd.f32 1.0, %v2024_v3 }
0x1168   :  { %2025 = vrcp.f32 %v743_v6 }
0x1175   :  { %v2026_v7 = vpop.eup %2025 }
0x1176   :  { %v750_v12 = vmul.f32 %v2026_v7, %v748_v11 }
0x11d6   :  { %v753_v9 = vpop.permute.xlu0 %752 }
0x11d7   :  { %v755_v10 = vmul.f32 %v2026_v7, %v753_v9 }
0x11d9   :  { %757 = vrot.lane.b32.xlu1 %v755_v10, %s2239_s25 }
0x124b   :  { %v758_v13 = vpop.permute.xlu1 %757 }
0x124c   :  { %v760_v14 = vadd.f32 %v758_v13, %v750_v12 }
0x124e   :  { %2027 = vtanh.f32 %v760_v14  ;;  %v835_v4 = vrot.slane %v760_v14, 7 }
0x125b   :  { %v2028_v15 = vpop.eup %2027 }
0x125c   :  { %763 = vrot.lane.b32.xlu0 %v2028_v15, %s2230_s27 }
0x12ce   :  { %v764_v17 = vpop.permute.xlu0 %763 }
0x12cf   :  { %v766_v18 = vmul.f32 %v2026_v7, %v764_v17 }
0x12d1   :  { %v773_v20 = vrot.slane %v766_v18, %v772_v16  ;;  %v775_v21 = vpack.c.bf16 %v766_v18, %v766_v18 }
0x12d3   :  { %v777_v23 = vrot.slane %v775_v21, 3  ;;  %v774_v24 = vsel %vm767_vm9, %v773_v20, %v685_v50 }
0x12d5   :  { %778 = vrot.lane.b32.xlu1 %v777_v23, %s2239_s25 }
0x1347   :  { %v779_v25 = vpop.permute.xlu1 %778 }
0x1348   :  { %1869 = vmatmul.mubr.msk.bf16.vlgmr.msra.gmra.mxu0 %vm172_vm2, %v779_v25 }
0x1349   :  { %1884 = vmatprep.mubr.msk.bf16.mxu0 %vm2237_vm0, %v2236_v0  ;;  %1881 = vmatpush3.bf16.msra.mxu0 %v2464_v40 }
0x134a   :  { %1882 = vmatprep.subr.bf16.mxu0 %v2236_v0 }
0x134d   :  { %1883 = vmatpush3.bf16.msra.mxu0 %v2467_v42 }
0x134e   :  { %1896 = vmatprep.subr.bf16.mxu0 %v2236_v0 }
0x1350   :  { %1885 = vmatmul.mubr.bf16.vlgmr.msra.gmra.mxu0 %v2238_v5 }
0x1351   :  { %1897 = vmatpush3.bf16.msra.mxu0 %v2464_v40  ;;  %1900 = vmatprep.mubr.msk.bf16.mxu0 %vm2237_vm0, %v2236_v0 }
0x1352   :  { %1898 = vmatprep.subr.bf16.mxu0 %v2236_v0 }
0x1355   :  { %1899 = vmatpush3.bf16.msra.mxu0 %v2467_v42 }
0x1356   :  { %1912 = vmatprep.subr.bf16.mxu0 %v2236_v0 }
0x1408   :  { %v817_v26 = vpop.f32.mrf.mxu0 }
0x1409   :  { %v824_v27 = vrot.slane %v817_v26, 1 }
0x140a   :  { %v1870_v28 = vpop.f32.mrf.mxu0 }
0x140b   :  { %v826_v29 = vadd.f32 %v824_v27, %v2339_v8 }
0x140c   :  { %v820_v30 = vpop.f32.mrf.mxu0 }
0x140d   :  { %2029 = vtanh.f32 %v826_v29  ;;  %v1719_v33 = vmul.f32 -1.442695, %v826_v29 }
0x140e   :  { %v1871_v31 = vpop.f32.mrf.mxu0 }
0x140f   :  { %2031 = vpow2.f32 %v1719_v33 }
0x1410   :  { %v984_v55 = vpop.f32.mrf.mxu0 }
0x1412   :  { %v1886_v56 = vpop.f32.mrf.mxu0 }
0x1414   :  { %v987_v57 = vpop.f32.mrf.mxu0 }
0x1416   :  { %v1887_v58 = vpop.f32.mrf.mxu0 }
0x141a   :  { %v2030_v32 = vpop.eup %2029 }
0x141b   :  { %839 = vrot.lane.b32.xlu0 %v2030_v32, %s2230_s27 }
0x141c   :  { %v2032_v34 = vpop.eup %2031 }
0x141d   :  { %v830_v2 = vadd.f32 1.0, %v2032_v34 }
0x141f   :  { %2033 = vrcp.f32 %v830_v2 }
0x142c   :  { %v2034_v35 = vpop.eup %2033 }
0x142d   :  { %v837_v38 = vmul.f32 %v2034_v35, %v835_v4 }
0x148d   :  { %v840_v36 = vpop.permute.xlu0 %839 }
0x148e   :  { %v842_v37 = vmul.f32 %v2034_v35, %v840_v36 }
0x1490   :  { %844 = vrot.lane.b32.xlu1 %v842_v37, %s2239_s25 }
0x1502   :  { %v845_v39 = vpop.permute.xlu1 %844 }
0x1503   :  { %v847_v8 = vadd.f32 %v845_v39, %v837_v38 }
0x1505   :  { %2035 = vtanh.f32 %v847_v8 }
0x1512   :  { %v2036_v45 = vpop.eup %2035 }
0x1513   :  { %850 = vrot.lane.b32.xlu0 %v2036_v45, %s2230_s27 }
0x1585   :  { %v851_v47 = vpop.permute.xlu0 %850 }
0x1586   :  { %v853_v49 = vmul.f32 %v2034_v35, %v851_v47 }
0x1588   :  { %v860_v5 = vrot.slane %v853_v49, %v859_v46 }
0x158a   :  { %v861_v50 = vsel %vm854_vm10, %v860_v5, %v774_v24 }
0x158b   :  { %v862_v54 = vpack.c.bf16 %v861_v50, %v861_v50 }
0x158d   :  { %876 = vrot.lane.b32.xlu1 %v862_v54, %s2239_s25 }
0x15ff   :  { %v877_v59 = vpop.permute.xlu1 %876 }
0x1600   :  { %1877 = vmatmul.mubr.msk.bf16.vlgmr.msra.gmra.mxu1 %vm172_vm2, %v877_v59 }
0x1601   :  { %1889 = vmatpush3.bf16.msra.mxu1 %v2464_v40  ;;  %1892 = vmatprep.mubr.msk.bf16.mxu1 %vm2237_vm0, %v2236_v0 }
0x1602   :  { %1890 = vmatprep.subr.bf16.mxu1 %v2236_v0 }
0x1605   :  { %1891 = vmatpush3.bf16.msra.mxu1 %v2467_v42 }
0x1606   :  { %1904 = vmatprep.subr.bf16.mxu1 %v2236_v0 }
0x16c0   :  { %v927_v61 = vpop.f32.mrf.mxu1 }
0x16c1   :  { %v2499_v62 = vadd.f32 %v1721_v60, %v927_v61 }
0x16c2   :  { %v1878_v63 = vpop.f32.mrf.mxu1 }
0x16c3   :  { %v990_v1 = vadd.f32 %v984_v55, %v2499_v62 }
0x16c4   :  { %v930_v3 = vpop.f32.mrf.mxu1 }
0x16c5   :  { %2037 = vtanh.f32 %v990_v1  ;;  %v1727_v9 = vmul.f32 -1.442695, %v990_v1 }
0x16c6   :  { %v1879_v6 = vpop.f32.mrf.mxu1 }
0x16c7   :  { %2039 = vpow2.f32 %v1727_v9 }
0x16d2   :  { %v2038_v7 = vpop.eup %2037 }
0x16d3   :  { %1000 = vrot.lane.b32.xlu0 %v2038_v7, %s2230_s27 }
0x16d4   :  { %v2040_v10 = vpop.eup %2039 }
0x16d5   :  { %v994_v11 = vadd.f32 1.0, %v2040_v10 }
0x16d7   :  { %2041 = vrcp.f32 %v994_v11 }
0x16e4   :  { %v2042_v12 = vpop.eup %2041 }
0x16e5   :  { %v998_v15 = vmul.f32 0.0, %v2042_v12 }
0x1745   :  { %v1001_v13 = vpop.permute.xlu0 %1000 }
0x1746   :  { %v1003_v14 = vmul.f32 %v2042_v12, %v1001_v13 }
0x1748   :  { %1005 = vrot.lane.b32.xlu1 %v1003_v14, %s2239_s25 }
0x17ba   :  { %v1006_v17 = vpop.permute.xlu1 %1005 }
0x17bb   :  { %v1008_v18 = vadd.f32 %v1006_v17, %v998_v15 }
0x17bd   :  { %2043 = vtanh.f32 %v1008_v18  ;;  %v1079_v4 = vrot.slane %v1008_v18, 7 }
0x17ca   :  { %v2044_v20 = vpop.eup %2043 }
0x17cb   :  { %1011 = vrot.lane.b32.xlu0 %v2044_v20, %s2230_s27 }
0x183d   :  { %v1012_v21 = vpop.permute.xlu0 %1011 }
0x183e   :  { %v1014_v23 = vmul.f32 %v2042_v12, %v1012_v21 }
0x1840   :  { %v1020_v24 = vpack.c.bf16 %v1014_v23, %v1014_v23  ;;  %v1018_v43 = vrot.slane %v1014_v23, %v246_v52 }
0x1842   :  { %1022 = vrot.lane.b32.xlu1 %v1020_v24, %s2239_s25  ;;  %v1019_v50 = vsel %vm241_vm3, %v1018_v43, 0.0 }
0x18b4   :  { %v1023_v25 = vpop.permute.xlu1 %1022 }
0x18b5   :  { %1893 = vmatmul.mubr.msk.bf16.vlgmr.msra.gmra.mxu1 %vm172_vm2, %v1023_v25 }
0x18b6   :  { %1905 = vmatpush3.bf16.msra.mxu1 %v2464_v40  ;;  %1908 = vmatprep.mubr.msk.bf16.mxu1 %vm2237_vm0, %v2236_v0 }
0x18b7   :  { %1906 = vmatprep.subr.bf16.mxu1 %v2236_v0 }
0x18ba   :  { %1907 = vmatpush3.bf16.msra.mxu1 %v2467_v42 }
0x18bb   :  { %1920 = vmatprep.subr.bf16.mxu1 %v2236_v0 }
0x1975   :  { %v1061_v26 = vpop.f32.mrf.mxu1 }
0x1976   :  { %v1068_v27 = vrot.slane %v1061_v26, 7 }
0x1977   :  { %v1894_v28 = vpop.f32.mrf.mxu1 }
0x1978   :  { %v1070_v29 = vadd.f32 %v1068_v27, %v2499_v62 }
0x1979   :  { %v1064_v30 = vpop.f32.mrf.mxu1 }
0x197a   :  { %2045 = vtanh.f32 %v1070_v29  ;;  %v1729_v33 = vmul.f32 -1.442695, %v1070_v29 }
0x197b   :  { %v1895_v31 = vpop.f32.mrf.mxu1 }
0x197c   :  { %2047 = vpow2.f32 %v1729_v33 }
0x1987   :  { %v2046_v32 = vpop.eup %2045 }
0x1988   :  { %1083 = vrot.lane.b32.xlu0 %v2046_v32, %s2230_s27 }
0x1989   :  { %v2048_v34 = vpop.eup %2047 }
0x198a   :  { %v1074_v2 = vadd.f32 1.0, %v2048_v34 }
0x198c   :  { %2049 = vrcp.f32 %v1074_v2 }
0x1999   :  { %v2050_v35 = vpop.eup %2049 }
0x199a   :  { %v1081_v38 = vmul.f32 %v2050_v35, %v1079_v4 }
0x19fa   :  { %v1084_v36 = vpop.permute.xlu0 %1083 }
0x19fb   :  { %v1086_v37 = vmul.f32 %v2050_v35, %v1084_v36 }
0x19fd   :  { %1088 = vrot.lane.b32.xlu1 %v1086_v37, %s2239_s25 }
0x1a6f   :  { %v1089_v39 = vpop.permute.xlu1 %1088 }
0x1a70   :  { %v1091_v8 = vadd.f32 %v1089_v39, %v1081_v38 }
0x1a72   :  { %2051 = vtanh.f32 %v1091_v8  ;;  %v1164_v10 = vrot.slane %v1091_v8, 7 }
0x1a7f   :  { %v2052_v41 = vpop.eup %2051 }
0x1a80   :  { %1094 = vrot.lane.b32.xlu0 %v2052_v41, %s2230_s27 }
0x1af2   :  { %v1095_v45 = vpop.permute.xlu0 %1094 }
0x1af3   :  { %v1097_v47 = vmul.f32 %v2050_v35, %v1095_v45 }
0x1af5   :  { %v1101_v49 = vrot.slane %v1097_v47, %v332_v53  ;;  %v1103_v5 = vpack.c.bf16 %v1097_v47, %v1097_v47 }
0x1af7   :  { %v1102_v54 = vsel %vm327_vm4, %v1101_v49, %v1019_v50  ;;  %v1105_v55 = vshrl.u32 %v1103_v5, 16 }
0x1af9   :  { %1107 = vrot.lane.b32.xlu1 %v1105_v55, %s2239_s25 }
0x1b6b   :  { %v1108_v56 = vpop.permute.xlu1 %1107 }
0x1b6c   :  { %1901 = vmatmul.mubr.msk.bf16.vlgmr.msra.gmra.mxu0 %vm172_vm2, %v1108_v56 }
0x1b6d   :  { %1913 = vmatpush3.bf16.msra.mxu0 %v2464_v40  ;;  %1916 = vmatprep.mubr.msk.bf16.mxu0 %vm2237_vm0, %v2236_v0 }
0x1b6e   :  { %1914 = vmatprep.subr.bf16.mxu0 %v2236_v0 }
0x1b71   :  { %1915 = vmatpush3.bf16.msra.mxu0 %v2467_v42 }
0x1b72   :  { %1928 = vmatprep.subr.bf16.mxu0 %v2236_v0 }
0x1c2c   :  { %v1146_v52 = vpop.f32.mrf.mxu0 }
0x1c2d   :  { %v1153_v53 = vrot.slane %v1146_v52, 6 }
0x1c2e   :  { %v1902_v57 = vpop.f32.mrf.mxu0 }
0x1c2f   :  { %v1155_v58 = vadd.f32 %v1153_v53, %v2499_v62 }
0x1c30   :  { %v1149_v59 = vpop.f32.mrf.mxu0 }
0x1c31   :  { %2053 = vtanh.f32 %v1155_v58  ;;  %v1731_v63 = vmul.f32 -1.442695, %v1155_v58 }
0x1c32   :  { %v1903_v60 = vpop.f32.mrf.mxu0 }
0x1c33   :  { %2055 = vpow2.f32 %v1731_v63 }
0x1c3e   :  { %v2054_v61 = vpop.eup %2053 }
0x1c3f   :  { %1168 = vrot.lane.b32.xlu0 %v2054_v61, %s2230_s27 }
0x1c40   :  { %v2056_v1 = vpop.eup %2055 }
0x1c41   :  { %v1159_v3 = vadd.f32 1.0, %v2056_v1 }
0x1c43   :  { %2057 = vrcp.f32 %v1159_v3 }
0x1c50   :  { %v2058_v6 = vpop.eup %2057 }
0x1c51   :  { %v1166_v11 = vmul.f32 %v2058_v6, %v1164_v10 }
0x1cb1   :  { %v1169_v7 = vpop.permute.xlu0 %1168 }
0x1cb2   :  { %v1171_v9 = vmul.f32 %v2058_v6, %v1169_v7 }
0x1cb4   :  { %1173 = vrot.lane.b32.xlu1 %v1171_v9, %s2239_s25 }
0x1d26   :  { %v1174_v12 = vpop.permute.xlu1 %1173 }
0x1d27   :  { %v1176_v13 = vadd.f32 %v1174_v12, %v1166_v11 }
0x1d29   :  { %2059 = vtanh.f32 %v1176_v13  ;;  %v1248_v36 = vrot.slane %v1176_v13, 7 }
0x1d36   :  { %v2060_v14 = vpop.eup %2059 }
0x1d37   :  { %1179 = vrot.lane.b32.xlu0 %v2060_v14, %s2230_s27 }
0x1da9   :  { %v1180_v15 = vpop.permute.xlu0 %1179 }
0x1daa   :  { %v1182_v17 = vmul.f32 %v2058_v6, %v1180_v15 }
0x1dac   :  { %v1186_v18 = vrot.slane %v1182_v17, %v420_v22  ;;  %v1188_v20 = vpack.c.bf16 %v1182_v17, %v1182_v17 }
0x1dae   :  { %v1187_v21 = vsel %vm415_vm5, %v1186_v18, %v1102_v54  ;;  %v1190_v23 = vrot.slane %v1188_v20, 1 }
0x1db0   :  { %1191 = vrot.lane.b32.xlu1 %v1190_v23, %s2239_s25 }
0x1e22   :  { %v1192_v24 = vpop.permute.xlu1 %1191 }
0x1e23   :  { %1909 = vmatmul.mubr.msk.bf16.vlgmr.msra.gmra.mxu1 %vm172_vm2, %v1192_v24 }
0x1e24   :  { %1921 = vmatpush3.bf16.msra.mxu1 %v2464_v40  ;;  %1924 = vmatprep.mubr.msk.bf16.mxu1 %vm2237_vm0, %v2236_v0 }
0x1e25   :  { %1922 = vmatprep.subr.bf16.mxu1 %v2236_v0 }
0x1e28   :  { %1923 = vmatpush3.bf16.msra.mxu1 %v2467_v42 }
0x1e29   :  { %1936 = vmatprep.subr.bf16.mxu1 %v2236_v0 }
0x1ee3   :  { %v1230_v22 = vpop.f32.mrf.mxu1 }
0x1ee4   :  { %v1237_v25 = vrot.slane %v1230_v22, 5 }
0x1ee5   :  { %v1910_v26 = vpop.f32.mrf.mxu1 }
0x1ee6   :  { %v1239_v27 = vadd.f32 %v1237_v25, %v2499_v62 }
0x1ee7   :  { %v1233_v28 = vpop.f32.mrf.mxu1 }
0x1ee8   :  { %2061 = vtanh.f32 %v1239_v27  ;;  %v1733_v31 = vmul.f32 -1.442695, %v1239_v27 }
0x1ee9   :  { %v1911_v29 = vpop.f32.mrf.mxu1 }
0x1eea   :  { %2063 = vpow2.f32 %v1733_v31 }
0x1ef5   :  { %v2062_v30 = vpop.eup %2061 }
0x1ef6   :  { %1252 = vrot.lane.b32.xlu0 %v2062_v30, %s2230_s27 }
0x1ef7   :  { %v2064_v32 = vpop.eup %2063 }
0x1ef8   :  { %v1243_v33 = vadd.f32 1.0, %v2064_v32 }
0x1efa   :  { %2065 = vrcp.f32 %v1243_v33 }
0x1f07   :  { %v2066_v34 = vpop.eup %2065 }
0x1f08   :  { %v1250_v37 = vmul.f32 %v2066_v34, %v1248_v36 }
0x1f68   :  { %v1253_v2 = vpop.permute.xlu0 %1252 }
0x1f69   :  { %v1255_v35 = vmul.f32 %v2066_v34, %v1253_v2 }
0x1f6b   :  { %1257 = vrot.lane.b32.xlu1 %v1255_v35, %s2239_s25 }
0x1fdd   :  { %v1258_v4 = vpop.permute.xlu1 %1257 }
0x1fde   :  { %v1260_v38 = vadd.f32 %v1258_v4, %v1250_v37 }
0x1fe0   :  { %2067 = vtanh.f32 %v1260_v38  ;;  %v1334_v3 = vrot.slane %v1260_v38, 7 }
0x1fed   :  { %v2068_v39 = vpop.eup %2067 }
0x1fee   :  { %1263 = vrot.lane.b32.xlu0 %v2068_v39, %s2230_s27 }
0x2060   :  { %v1264_v8 = vpop.permute.xlu0 %1263 }
0x2061   :  { %v1266_v41 = vmul.f32 %v2066_v34, %v1264_v8 }
0x2063   :  { %v1270_v43 = vrot.slane %v1266_v41, %v507_v48  ;;  %v1272_v45 = vpack.c.bf16 %v1266_v41, %v1266_v41 }
0x2065   :  { %v1271_v47 = vsel %vm502_vm6, %v1270_v43, %v1187_v21  ;;  %v1274_v49 = vshrl.u32 %v1272_v45, 16 }
0x2067   :  { %v1276_v5 = vrot.slane %v1274_v49, 1 }
0x2069   :  { %1277 = vrot.lane.b32.xlu1 %v1276_v5, %s2239_s25 }
0x20db   :  { %v1278_v50 = vpop.permute.xlu1 %1277 }
0x20dc   :  { %1917 = vmatmul.mubr.msk.bf16.vlgmr.msra.gmra.mxu0 %vm172_vm2, %v1278_v50 }
0x20dd   :  { %1929 = vmatpush3.bf16.msra.mxu0 %v2464_v40  ;;  %1932 = vmatprep.mubr.msk.bf16.mxu0 %vm2237_vm0, %v2236_v0 }
0x20de   :  { %1930 = vmatprep.subr.bf16.mxu0 %v2236_v0 }
0x20e1   :  { %1931 = vmatpush3.bf16.msra.mxu0 %v2467_v42 }
0x20e2   :  { %1944 = vmatprep.subr.bf16.mxu0 %v2236_v0 }
0x219c   :  { %v1316_v48 = vpop.f32.mrf.mxu0 }
0x219d   :  { %v1323_v54 = vrot.slane %v1316_v48, 4 }
0x219e   :  { %v1918_v55 = vpop.f32.mrf.mxu0 }
0x219f   :  { %v1325_v56 = vadd.f32 %v1323_v54, %v2499_v62 }
0x21a0   :  { %v1319_v52 = vpop.f32.mrf.mxu0 }
0x21a1   :  { %2069 = vtanh.f32 %v1325_v56  ;;  %v1735_v58 = vmul.f32 -1.442695, %v1325_v56 }
0x21a2   :  { %v1919_v53 = vpop.f32.mrf.mxu0 }
0x21a3   :  { %2071 = vpow2.f32 %v1735_v58 }
0x21ae   :  { %v2070_v57 = vpop.eup %2069 }
0x21af   :  { %1338 = vrot.lane.b32.xlu0 %v2070_v57, %s2230_s27 }
0x21b0   :  { %v2072_v59 = vpop.eup %2071 }
0x21b1   :  { %v1329_v60 = vadd.f32 1.0, %v2072_v59 }
0x21b3   :  { %2073 = vrcp.f32 %v1329_v60 }
0x21c0   :  { %v2074_v61 = vpop.eup %2073 }
0x21c1   :  { %v1336_v6 = vmul.f32 %v2074_v61, %v1334_v3 }
0x2221   :  { %v1339_v63 = vpop.permute.xlu0 %1338 }
0x2222   :  { %v1341_v1 = vmul.f32 %v2074_v61, %v1339_v63 }
0x2224   :  { %1343 = vrot.lane.b32.xlu1 %v1341_v1, %s2239_s25 }
0x2296   :  { %v1344_v7 = vpop.permute.xlu1 %1343 }
0x2297   :  { %v1346_v9 = vadd.f32 %v1344_v7, %v1336_v6 }
0x2299   :  { %2075 = vtanh.f32 %v1346_v9 }
0x22a6   :  { %v2076_v10 = vpop.eup %2075 }
0x22a7   :  { %1349 = vrot.lane.b32.xlu0 %v2076_v10, %s2230_s27 }
0x2319   :  { %v1350_v11 = vpop.permute.xlu0 %1349 }
0x231a   :  { %v1352_v12 = vmul.f32 %v2074_v61, %v1350_v11 }
0x231c   :  { %v1356_v13 = vrot.slane %v1352_v12, %v596_v19  ;;  %v1358_v14 = vpack.c.bf16 %v1352_v12, %v1352_v12 }
0x231e   :  { %v1357_v15 = vsel %vm591_vm7, %v1356_v13, %v1271_v47  ;;  %v1360_v17 = vrot.slane %v1358_v14, 2 }
0x2320   :  { %1361 = vrot.lane.b32.xlu1 %v1360_v17, %s2239_s25 }
0x2392   :  { %v1362_v18 = vpop.permute.xlu1 %1361 }
0x2393   :  { %1925 = vmatmul.mubr.msk.bf16.vlgmr.msra.gmra.mxu1 %vm172_vm2, %v1362_v18 }
0x2394   :  { %1937 = vmatpush3.bf16.msra.mxu1 %v2464_v40  ;;  %1940 = vmatprep.mubr.msk.bf16.mxu1 %vm2237_vm0, %v2236_v0 }
0x2395   :  { %1938 = vmatprep.subr.bf16.mxu1 %v2236_v0 }
0x2398   :  { %1939 = vmatpush3.bf16.msra.mxu1 %v2467_v42  ;;  %v1418_v42 = vrot.slane %v1346_v9, 7 }
0x2453   :  { %v1400_v19 = vpop.f32.mrf.mxu1 }
0x2454   :  { %v1407_v20 = vrot.slane %v1400_v19, 3 }
0x2455   :  { %v1926_v21 = vpop.f32.mrf.mxu1 }
0x2456   :  { %v1409_v23 = vadd.f32 %v1407_v20, %v2499_v62 }
0x2457   :  { %v1403_v24 = vpop.f32.mrf.mxu1 }
0x2458   :  { %2077 = vtanh.f32 %v1409_v23  ;;  %v1737_v26 = vmul.f32 -1.442695, %v1409_v23 }
0x2459   :  { %v1927_v22 = vpop.f32.mrf.mxu1 }
0x245a   :  { %2079 = vpow2.f32 %v1737_v26  ;;  %v1971_v26 = vld [vmem:[#allocation10 + $0x8] sm:$0xff]  }
0x2465   :  { %v2078_v25 = vpop.eup %2077 }
0x2466   :  { %1422 = vrot.lane.b32.xlu0 %v2078_v25, %s2230_s27 }
0x2467   :  { %v2080_v40 = vpop.eup %2079 }
0x2468   :  { %v1413_v27 = vadd.f32 1.0, %v2080_v40  ;;  %v1972_v40 = vld [vmem:[#allocation10] sm:$0xff]  }
0x246a   :  { %2081 = vrcp.f32 %v1413_v27 }
0x2477   :  { %v2082_v28 = vpop.eup %2081 }
0x2478   :  { %v1420_v31 = vmul.f32 %v2082_v28, %v1418_v42 }
0x24d8   :  { %v1423_v29 = vpop.permute.xlu0 %1422 }
0x24d9   :  { %v1425_v30 = vmul.f32 %v2082_v28, %v1423_v29 }
0x24db   :  { %1427 = vrot.lane.b32.xlu1 %v1425_v30, %s2239_s25 }
0x254d   :  { %v1428_v32 = vpop.permute.xlu1 %1427 }
0x254e   :  { %v1430_v33 = vadd.f32 %v1428_v32, %v1420_v31 }
0x2550   :  { %2083 = vtanh.f32 %v1430_v33  ;;  %v1504_v53 = vrot.slane %v1430_v33, 7 }
0x255d   :  { %v2084_v34 = vpop.eup %2083 }
0x255e   :  { %1433 = vrot.lane.b32.xlu0 %v2084_v34, %s2230_s27 }
0x25d0   :  { %v1434_v2 = vpop.permute.xlu0 %1433 }
0x25d1   :  { %v1436_v35 = vmul.f32 %v2082_v28, %v1434_v2 }
0x25d3   :  { %v1440_v36 = vrot.slane %v1436_v35, %v683_v44  ;;  %v1442_v37 = vpack.c.bf16 %v1436_v35, %v1436_v35 }
0x25d5   :  { %v1441_v4 = vsel %vm678_vm8, %v1440_v36, %v1357_v15  ;;  %v1444_v38 = vshrl.u32 %v1442_v37, 16 }
0x25d7   :  { %v1446_v39 = vrot.slane %v1444_v38, 2 }
0x25d9   :  { %1447 = vrot.lane.b32.xlu1 %v1446_v39, %s2239_s25 }
0x264b   :  { %v1448_v8 = vpop.permute.xlu1 %1447 }
0x264c   :  { %1933 = vmatmul.mubr.msk.bf16.vlgmr.msra.gmra.mxu0 %vm172_vm2, %v1448_v8 }
0x264d   :  { %1948 = vmatprep.mubr.msk.bf16.mxu0 %vm2237_vm0, %v2236_v0  ;;  %1945 = vmatpush3.bf16.msra.mxu0 %v1971_v26 }
0x264e   :  { %1946 = vmatprep.subr.bf16.mxu0 %v2236_v0  ;;  %v1742_v0 = vld [vmem:[%s2625_s6] ss:$0 sm:$0xff] }
0x2651   :  { %1947 = vmatpush3.bf16.msra.mxu0 %v1972_v40 }
0x270c   :  { %v1486_v41 = vpop.f32.mrf.mxu0 }
0x270d   :  { %v1493_v43 = vrot.slane %v1486_v41, 2 }
0x270e   :  { %v1934_v45 = vpop.f32.mrf.mxu0 }
0x270f   :  { %v1495_v47 = vadd.f32 %v1493_v43, %v2499_v62 }
0x2710   :  { %v1489_v44 = vpop.f32.mrf.mxu0 }
0x2711   :  { %2085 = vtanh.f32 %v1495_v47  ;;  %v1739_v50 = vmul.f32 -1.442695, %v1495_v47 }
0x2712   :  { %v1935_v49 = vpop.f32.mrf.mxu0 }
0x2713   :  { %2087 = vpow2.f32 %v1739_v50 }
0x271e   :  { %v2086_v5 = vpop.eup %2085 }
0x271f   :  { %1508 = vrot.lane.b32.xlu0 %v2086_v5, %s2230_s27 }
0x2720   :  { %v2088_v48 = vpop.eup %2087 }
0x2721   :  { %v1499_v54 = vadd.f32 1.0, %v2088_v48 }
0x2723   :  { %2089 = vrcp.f32 %v1499_v54 }
0x2730   :  { %v2090_v55 = vpop.eup %2089 }
0x2731   :  { %v1506_v57 = vmul.f32 %v2090_v55, %v1504_v53 }
0x2791   :  { %v1509_v56 = vpop.permute.xlu0 %1508 }
0x2792   :  { %v1511_v52 = vmul.f32 %v2090_v55, %v1509_v56 }
0x2794   :  { %1513 = vrot.lane.b32.xlu1 %v1511_v52, %s2239_s25 }
0x2806   :  { %v1514_v58 = vpop.permute.xlu1 %1513 }
0x2807   :  { %v1516_v59 = vadd.f32 %v1514_v58, %v1506_v57 }
0x2809   :  { %2091 = vtanh.f32 %v1516_v59  ;;  %v1588_v24 = vrot.slane %v1516_v59, 7 }
0x2816   :  { %v2092_v60 = vpop.eup %2091 }
0x2817   :  { %1519 = vrot.lane.b32.xlu0 %v2092_v60, %s2230_s27 }
0x2889   :  { %v1520_v61 = vpop.permute.xlu0 %1519 }
0x288a   :  { %v1522_v63 = vmul.f32 %v2090_v55, %v1520_v61 }
0x288c   :  { %v1526_v1 = vrot.slane %v1522_v63, %v772_v16  ;;  %v1528_v3 = vpack.c.bf16 %v1522_v63, %v1522_v63 }
0x288e   :  { %v1530_v6 = vrot.slane %v1528_v3, 3  ;;  %v1527_v7 = vsel %vm767_vm9, %v1526_v1, %v1441_v4 }
0x2890   :  { %1531 = vrot.lane.b32.xlu1 %v1530_v6, %s2239_s25 }
0x2902   :  { %v1532_v9 = vpop.permute.xlu1 %1531 }
0x2903   :  { %1941 = vmatmul.mubr.msk.bf16.vlgmr.msra.gmra.mxu1 %vm172_vm2, %v1532_v9 }
0x29c3   :  { %v1570_v10 = vpop.f32.mrf.mxu1 }
0x29c4   :  { %v1577_v11 = vrot.slane %v1570_v10, 1 }
0x29c5   :  { %v1942_v12 = vpop.f32.mrf.mxu1 }
0x29c6   :  { %v1579_v13 = vadd.f32 %v1577_v11, %v2499_v62 }
0x29c7   :  { %v1573_v14 = vpop.f32.mrf.mxu1 }
0x29c8   :  { %2093 = vtanh.f32 %v1579_v13  ;;  %v1741_v16 = vmul.f32 -1.442695, %v1579_v13 }
0x29c9   :  { %v1943_v15 = vpop.f32.mrf.mxu1 }
0x29ca   :  { %2095 = vpow2.f32 %v1741_v16 }
0x29d5   :  { %v2094_v17 = vpop.eup %2093 }
0x29d6   :  { %1592 = vrot.lane.b32.xlu0 %v2094_v17, %s2230_s27 }
0x29d7   :  { %v2096_v18 = vpop.eup %2095 }
0x29d8   :  { %v1583_v19 = vadd.f32 1.0, %v2096_v18 }
0x29da   :  { %2097 = vrcp.f32 %v1583_v19 }
0x29e7   :  { %v2098_v20 = vpop.eup %2097 }
0x29e8   :  { %v1590_v22 = vmul.f32 %v2098_v20, %v1588_v24 }
0x2a48   :  { %v1593_v21 = vpop.permute.xlu0 %1592 }
0x2a49   :  { %v1595_v23 = vmul.f32 %v2098_v20, %v1593_v21 }
0x2a4b   :  { %1597 = vrot.lane.b32.xlu1 %v1595_v23, %s2239_s25 }
0x2abd   :  { %v1598_v25 = vpop.permute.xlu1 %1597 }
0x2abe   :  { %v1600_v62 = vadd.f32 %v1598_v25, %v1590_v22 }
0x2ac0   :  { %2099 = vtanh.f32 %v1600_v62 }
0x2acd   :  { %v2100_v27 = vpop.eup %2099 }
0x2ace   :  { %1603 = vrot.lane.b32.xlu0 %v2100_v27, %s2230_s27  ;;  %s2240_s27 = smov [#allocation11]  }
0x2acf   :  { %s1689_s30 = sshll.u32 %s2240_s27, 4  ;;  %s1690_s30 = int_to_ptr.vmem [resolvable:$true] %s1689_s30 }
0x2ad0   :  { %s2201_s8 = scalar_lea.vmem %s1690_s30, 128  ;;  %p2206_p12 = scmp.lt.s32.totalorder %s1690_s30, %s1690_s30 }
0x2ad1   :  { %p2202_p11 = scmp.ne.s32.totalorder %s1690_s30, %s2201_s8  ;;  %p2207_p13 = scmp.lt.s32.totalorder %s2201_s8, %s2201_s8 }
0x2ad3   :  { %p2208_p0 = por %p2207_p13, %p2206_p12 }
0x2ad5   :  { %p2209_p1 = pnand %p2208_p0, %p2202_p11 }
0x2b40   :  { %v1604_v28 = vpop.permute.xlu0 %1603 }
0x2b41   :  { %v1606_v29 = vmul.f32 %v2098_v20, %v1604_v28 }
0x2b43   :  { %v1610_v30 = vrot.slane %v1606_v29, %v859_v46 }
0x2b45   :  { %v1611_v42 = vsel %vm854_vm10, %v1610_v30, %v1527_v7 }
0x2b46   :  { %v1612_v31 = vpack.c.bf16 %v1611_v42, %v1611_v42 }
0x2b48   :  { %1625 = vrot.lane.b32.xlu1 %v1612_v31, %s2239_s25 }
0x2bba   :  { %v1626_v32 = vpop.permute.xlu1 %1625 }
0x2bbb   :  { %1949 = vmatmul.mubr.msk.bf16.vlgmr.msra.gmra.mxu0 %vm172_vm2, %v1626_v32 }
0x2c7b   :  { %v1676_v33 = vpop.f32.mrf.mxu0 }
0x2c7c   :  { %v1677_v34 = vadd.f32 %v1742_v0, %v1676_v33 }
0x2c7d   :  { %v1950_v2 = vpop.f32.mrf.mxu0 }
0x2c7e   :  { %1682 = vst [vmem:[#allocation11] sm:$0xff] %v1677_v34 }
0x2c7f   :  { %v1679_v46 = vpop.f32.mrf.mxu0 }
0x2c80   :  { %2212 = shalt.err (!%p2209_p1)
}
0x2c81   :  { %1692 = dma.vmem_to_hbm [thread:$0]  %s1690_s30, 128, %s2626_s7, [#allocation4]   ;;  %v1951_v51 = vpop.f32.mrf.mxu0 }
0x2c82   :  { %2227 = dma.done.wait [#allocation4], 128  }
0x2c83   :  { %2228 = vsyncadd [#allocation4], 4294967168 }
0x2c84   :  { %1696 = vsyncpa [#allocation3], 1 }
0x2c85   :  { %1697 = vsyncpa [#allocation6], 1 }
0x2c86   :  { %1698 = vsyncpa [#allocation9], 1 }
0x2c87   :  { %1699 = vsyncpa [#allocation4], 1 }

</bundles_post_ra>
